<compile_context>
chip_gen: v7x
topology: tpu7x:2x2x1
jax: 0.10.0
libtpu: 0.0.40
codegen_flags: <defaults>
</compile_context>

<pallas_src>
import numpy as np
import jax
import jax.numpy as jnp
from jax import lax
from jax.experimental import pallas as pl

# ----------------------------- configs (small, synthetic) -----------------------------
BATCH    = 2
SEQ_LEN  = 16    # configs.seq_len
PRED_LEN = 8     # configs.pred_len
D_MODEL  = 32    # configs.d_model
ENC_IN   = 4     # configs.enc_in
E_LAYERS = 2     # configs.e_layers
MA_K     = 13    # series_decomp kernel size
EPS_LN   = 1e-5  # nn.LayerNorm default eps
EPS_NORM = 1e-5  # use_norm stdev eps
_INV_SQRT2 = 0.7071067811865476

ROWS = BATCH * ENC_IN        # 8  (batch folded into rows)
NBLK = 2 * E_LAYERS          # 4  encoder blocks: seasonal[0..E-1], trend[0..E-1]
NDVEC = 2 + 3 * NBLK         # emb bias, trend bias, then (b1, gamma, beta) per block


# ----------------------------- shared math (kernel & reference) -----------------------
def _gelu(x):
    # exact GELU (erf), matches torch.nn.GELU()
    return 0.5 * x * (1.0 + lax.erf(x * _INV_SQRT2))


def _layernorm(x, g, b):
    mu = jnp.mean(x, axis=-1, keepdims=True)
    var = jnp.mean((x - mu) * (x - mu), axis=-1, keepdims=True)
    return (x - mu) * lax.rsqrt(var + EPS_LN) * g + b


def moving_avg_matrix(d, k):
    """(d, d) matrix A such that (x @ A) == AvgPool1d(k, stride=1) with edge-replication
    padding of (k-1)//2 on both sides, applied along the last axis of x."""
    half = (k - 1) // 2
    A = np.zeros((d, d), dtype=np.float32)
    for j in range(d):
        for s in range(-half, half + 1):
            i = min(max(j + s, 0), d - 1)
            A[i, j] += 1.0 / k
    return jnp.asarray(A)


# ----------------------------- Pallas kernel ------------------------------------------
def patchmlp_kernel(x_ref, wemb_ref, w1_ref, w2_ref, dvec_ref, rvec_ref,
                    wproj_ref, pbias_ref, out_ref):
    # x: [ROWS, L] with rows ordered (batch, variable)
    x = x_ref[...]
    V = dvec_ref[...]          # [NDVEC, D]  bias / LayerNorm vectors
    RB = rvec_ref[...]         # [NBLK, ROWS] ff2 biases (tiled per batch)

    # use_norm: per-(batch, variable) instance normalization over time (last axis)
    mean = jnp.mean(x, axis=-1, keepdims=True)                  # [ROWS, 1]
    xc = x - mean
    var = jnp.mean(xc * xc, axis=-1, keepdims=True)             # unbiased=False
    stdev = jnp.sqrt(var + EPS_NORM)                            # [ROWS, 1]
    xn = xc / stdev                                             # [ROWS, L]

    # Emb (Linear L->D) and fused trend (= emb @ A); two independent MXU matmuls.
    emb = jnp.dot(xn, wemb_ref[0], preferred_element_type=jnp.float32) + V[0]   # [ROWS, D]
    trend = jnp.dot(xn, wemb_ref[1], preferred_element_type=jnp.float32) + V[1]  # [ROWS, D]
    seasonal = emb - trend

    def enc_block(z, i):
        w1 = w1_ref[i]                       # [D, D]   (pre-transposed: z @ w1)
        w2 = w2_ref[i]                       # [ROWS, ROWS] block-diag kron(I_B, W2)
        b1 = V[2 + 3 * i + 0]
        g = V[2 + 3 * i + 1]
        be = V[2 + 3 * i + 2]
        rb = RB[i][:, None]                  # [ROWS, 1]
        # ff1 + residual + norm1
        y0 = _gelu(jnp.dot(z, w1, preferred_element_type=jnp.float32) + b1)
        y0 = _layernorm(y0 + z, g, be)
        # ff2 (mixes variables within a batch) without transposes: block-diag matmul
        y1 = _gelu(jnp.dot(w2, y0, preferred_element_type=jnp.float32) + rb)
        # gated residual + norm1 (again, as in the PyTorch forward)
        return _layernorm(y1 * y0 + z, g, be)

    for l in range(E_LAYERS):
        seasonal = enc_block(seasonal, l)
        trend = enc_block(trend, E_LAYERS + l)

    xo = seasonal + trend                                                        # [ROWS, D]
    dec = jnp.dot(xo, wproj_ref[...], preferred_element_type=jnp.float32) + pbias_ref[...]
    # de-normalize; output stays in [ROWS, P] layout (permute happens in the wrapper)
    out_ref[...] = dec * stdev + mean


def patchmlp_forward(x_enc, packed):
    B, L, N = x_enc.shape
    # [B, L, N] -> [B, N, L] -> [B*N, L]  (layout plumbing in XLA, not in the kernel)
    z_in = jnp.transpose(x_enc, (0, 2, 1)).reshape(B * N, L)
    out = pl.pallas_call(
        patchmlp_kernel,
        out_shape=jax.ShapeDtypeStruct((B * N, PRED_LEN), jnp.float32),
    )(z_in, *packed)
    # [B*N, P] -> [B, N, P] -> [B, P, N]
    return jnp.transpose(out.reshape(B, N, PRED_LEN), (0, 2, 1))


# ----------------------------- pure-JAX reference (for verification) ------------------
def reference_forward(x_enc, params):
    (A, ew, eb, sw1, sb1, sw2, sb2, sg, sbe,
     tw1, tb1, tw2, tb2, tg, tbe, pw, pb) = params
    hp = lax.Precision.HIGHEST

    mean = jnp.mean(x_enc, axis=1, keepdims=True)
    xc = x_enc - mean
    var = jnp.mean(xc * xc, axis=1, keepdims=True)
    stdev = jnp.sqrt(var + EPS_NORM)
    xn = xc / stdev
    z = jnp.transpose(xn, (0, 2, 1))                                        # [B, N, L]
    emb = jnp.einsum("bnl,dl->bnd", z, ew, precision=hp) + eb               # [B, N, D]
    trend = jnp.einsum("bnd,de->bne", emb, A, precision=hp)
    seasonal = emb - trend

    def enc(x, w1, b1, w2, b2, g, be):
        y0 = _gelu(jnp.einsum("bnd,ed->bne", x, w1, precision=hp) + b1)
        y0 = _layernorm(y0 + x, g, be)
        y1 = jnp.transpose(y0, (0, 2, 1))
        y1 = _gelu(jnp.einsum("bdn,mn->bdm", y1, w2, precision=hp) + b2)
        y1 = jnp.transpose(y1, (0, 2, 1))
        return _layernorm(y1 * y0 + x, g, be)

    for l in range(E_LAYERS):
        seasonal = enc(seasonal, sw1[l], sb1[l], sw2[l], sb2[l], sg[l], sbe[l])
        trend = enc(trend, tw1[l], tb1[l], tw2[l], tb2[l], tg[l], tbe[l])

    xo = seasonal + trend
    dec = jnp.einsum("bnd,pd->bnp", xo, pw, precision=hp) + pb              # [B, N, P]
    dec = jnp.transpose(dec, (0, 2, 1))                                     # [B, P, N]
    dec = dec * stdev + mean
    return dec


# ----------------------------- deterministic parameter init ---------------------------
def init_params(key):
    ks = jax.random.split(key, 32)
    it = iter(ks)

    def uni(shape, fan_in):
        b = 1.0 / np.sqrt(fan_in)
        return jax.random.uniform(next(it), shape, jnp.float32, -b, b)

    A = moving_avg_matrix(D_MODEL, MA_K)
    ew = uni((D_MODEL, SEQ_LEN), SEQ_LEN)          # Emb weight (out, in)
    eb = uni((1, D_MODEL), SEQ_LEN)                # Emb bias

    def enc_stack():
        w1 = uni((E_LAYERS, D_MODEL, D_MODEL), D_MODEL)
        b1 = uni((E_LAYERS, 1, D_MODEL), D_MODEL)
        w2 = uni((E_LAYERS, ENC_IN, ENC_IN), ENC_IN)
        b2 = uni((E_LAYERS, 1, ENC_IN), ENC_IN)
        g = jnp.ones((E_LAYERS, 1, D_MODEL), jnp.float32)     # LayerNorm weight
        be = jnp.zeros((E_LAYERS, 1, D_MODEL), jnp.float32)   # LayerNorm bias
        return w1, b1, w2, b2, g, be

    sw1, sb1, sw2, sb2, sg, sbe = enc_stack()
    tw1, tb1, tw2, tb2, tg, tbe = enc_stack()

    pw = uni((PRED_LEN, D_MODEL), D_MODEL)         # projector weight (out, in)
    pb = uni((1, PRED_LEN), D_MODEL)               # projector bias

    return (A, ew, eb, sw1, sb1, sw2, sb2, sg, sbe,
            tw1, tb1, tw2, tb2, tg, tbe, pw, pb)


def pack_params(raw):
    """Pack the 17 raw parameter tensors into 7 lane-dense slabs for the kernel."""
    (A, ew, eb, sw1, sb1, sw2, sb2, sg, sbe,
     tw1, tb1, tw2, tb2, tg, tbe, pw, pb) = raw

    W_emb = ew.T                                   # [L, D]  so kernel does xn @ W_emb
    b_emb = eb.reshape(D_MODEL)
    W_tr = W_emb @ A                               # fused moving-average weights
    b_tr = b_emb @ A
    wemb = jnp.stack([W_emb, W_tr], axis=0)        # [2, L, D]

    eye_b = jnp.eye(BATCH, dtype=jnp.float32)
    w1_list, w2_list, rvec_rows = [], [], []
    dvec_rows = [b_emb, b_tr]
    for (w1s, b1s, w2s, b2s, gs, bes) in ((sw1, sb1, sw2, sb2, sg, sbe),
                                          (tw1, tb1, tw2, tb2, tg, tbe)):
        for l in range(E_LAYERS):
            w1_list.append(w1s[l].T)                               # [D, D]
            w2_list.append(jnp.kron(eye_b, w2s[l]))                # [ROWS, ROWS] block-diag
            dvec_rows += [b1s[l].reshape(D_MODEL),
                          gs[l].reshape(D_MODEL),
                          bes[l].reshape(D_MODEL)]
            rvec_rows.append(jnp.tile(b2s[l].reshape(ENC_IN), BATCH))   # [ROWS]

    W1_all = jnp.stack(w1_list)                    # [NBLK, D, D]
    W2_all = jnp.stack(w2_list)                    # [NBLK, ROWS, ROWS]
    dvecs = jnp.stack(dvec_rows)                   # [NDVEC, D]
    rvecs = jnp.stack(rvec_rows)                   # [NBLK, ROWS]
    W_proj = pw.T                                  # [D, P]
    pbias = pb.reshape(1, PRED_LEN)                # [1, P]
    return (wemb, W1_all, W2_all, dvecs, rvecs, W_proj, pbias)


# ----------------------------- main ----------------------------------------------------
if __name__ == "__main__":
    key = jax.random.PRNGKey(0)
    k_x, k_p = jax.random.split(key)
    x_enc = jax.random.normal(k_x, (BATCH, SEQ_LEN, ENC_IN), jnp.float32)
    raw = init_params(k_p)
    packed = pack_params(raw)

    out = jax.block_until_ready(patchmlp_forward(x_enc, packed))
    ref = jax.block_until_ready(reference_forward(x_enc, raw))

    assert out.shape == (BATCH, PRED_LEN, ENC_IN), out.shape
    assert bool(jnp.all(jnp.isfinite(out)))
    np.testing.assert_allclose(np.asarray(out), np.asarray(ref), rtol=2e-3, atol=2e-3)
    print("KERNEL_OK")
</pallas_src>

<mosaic_0001>
module attributes {stable_mosaic.version = 11 : i64} {
  func.func @patchmlp_kernel(%arg0: memref<8x16xf32, #tpu.memory_space<vmem>>, %arg1: memref<2x16x32xf32, #tpu.memory_space<vmem>>, %arg2: memref<4x32x32xf32, #tpu.memory_space<vmem>>, %arg3: memref<4x8x8xf32, #tpu.memory_space<vmem>>, %arg4: memref<14x32xf32, #tpu.memory_space<vmem>>, %arg5: memref<4x8xf32, #tpu.memory_space<vmem>>, %arg6: memref<32x8xf32, #tpu.memory_space<vmem>>, %arg7: memref<1x8xf32, #tpu.memory_space<vmem>>, %arg8: memref<8x8xf32, #tpu.memory_space<vmem>>) attributes {dimension_semantics = [], scalar_prefetch = 0 : i64, scratch_operands = 0 : i64, tpu.core_type = #tpu.core_type<tc>} {
    %c0 = arith.constant 0 : index
    %c0_0 = arith.constant 0 : index
    %0 = vector.load %arg0[%c0, %c0_0] : memref<8x16xf32, #tpu.memory_space<vmem>>, vector<8x16xf32>
    %c0_1 = arith.constant 0 : index
    %c0_2 = arith.constant 0 : index
    %1 = vector.load %arg4[%c0_1, %c0_2] : memref<14x32xf32, #tpu.memory_space<vmem>>, vector<14x32xf32>
    %c0_3 = arith.constant 0 : index
    %c0_4 = arith.constant 0 : index
    %2 = vector.load %arg5[%c0_3, %c0_4] : memref<4x8xf32, #tpu.memory_space<vmem>>, vector<4x8xf32>
    %cst = arith.constant dense<0.000000e+00> : vector<8xf32>
    %3 = vector.multi_reduction <add>, %0, %cst [1] : vector<8x16xf32> to vector<8xf32>
    %4 = vector.shape_cast %3 : vector<8xf32> to vector<8x1xf32>
    %cst_5 = arith.constant 1.600000e+01 : f32
    %5 = vector.broadcast %cst_5 : f32 to vector<8x1xf32>
    %6 = arith.divf %4, %5 : vector<8x1xf32>
    %7 = vector.broadcast %6 : vector<8x1xf32> to vector<8x16xf32>
    %8 = arith.subf %0, %7 : vector<8x16xf32>
    %9 = arith.mulf %8, %8 : vector<8x16xf32>
    %cst_6 = arith.constant dense<0.000000e+00> : vector<8xf32>
    %10 = vector.multi_reduction <add>, %9, %cst_6 [1] : vector<8x16xf32> to vector<8xf32>
    %11 = vector.shape_cast %10 : vector<8xf32> to vector<8x1xf32>
    %cst_7 = arith.constant 1.600000e+01 : f32
    %12 = vector.broadcast %cst_7 : f32 to vector<8x1xf32>
    %13 = arith.divf %11, %12 : vector<8x1xf32>
    %cst_8 = arith.constant 9.99999974E-6 : f32
    %14 = vector.broadcast %cst_8 : f32 to vector<8x1xf32>
    %15 = arith.addf %13, %14 : vector<8x1xf32>
    %16 = math.sqrt %15 : vector<8x1xf32>
    %17 = vector.broadcast %16 : vector<8x1xf32> to vector<8x16xf32>
    %18 = arith.divf %8, %17 : vector<8x16xf32>
    %c0_9 = arith.constant 0 : index
    %c0_10 = arith.constant 0 : index
    %c0_11 = arith.constant 0 : index
    %19 = vector.load %arg1[%c0_9, %c0_10, %c0_11] : memref<2x16x32xf32, #tpu.memory_space<vmem>>, vector<1x16x32xf32>
    %20 = vector.shape_cast %19 : vector<1x16x32xf32> to vector<16x32xf32>
    %cst_12 = arith.constant dense<0.000000e+00> : vector<8x32xf32>
    %21 = tpu.matmul %18, %20, %cst_12 {dimension_numbers = #tpu.dot_dimension_numbers<[1], [0], [0], [1], [0, 0, 1, 1], [], []>} : vector<8x16xf32>, vector<16x32xf32>, vector<8x32xf32> -> vector<8x32xf32>
    %22 = vector.extract_strided_slice %1 {offsets = [0, 0], sizes = [1, 32], strides = [1, 1]} : vector<14x32xf32> to vector<1x32xf32>
    %23 = vector.shape_cast %22 : vector<1x32xf32> to vector<32xf32>
    %24 = vector.shape_cast %23 : vector<32xf32> to vector<1x32xf32>
    %25 = vector.broadcast %24 : vector<1x32xf32> to vector<8x32xf32>
    %26 = arith.addf %21, %25 : vector<8x32xf32>
    %c1 = arith.constant 1 : index
    %c0_13 = arith.constant 0 : index
    %c0_14 = arith.constant 0 : index
    %27 = vector.load %arg1[%c1, %c0_13, %c0_14] : memref<2x16x32xf32, #tpu.memory_space<vmem>>, vector<1x16x32xf32>
    %28 = vector.shape_cast %27 : vector<1x16x32xf32> to vector<16x32xf32>
    %cst_15 = arith.constant dense<0.000000e+00> : vector<8x32xf32>
    %29 = tpu.matmul %18, %28, %cst_15 {dimension_numbers = #tpu.dot_dimension_numbers<[1], [0], [0], [1], [0, 0, 1, 1], [], []>} : vector<8x16xf32>, vector<16x32xf32>, vector<8x32xf32> -> vector<8x32xf32>
    %30 = vector.extract_strided_slice %1 {offsets = [1, 0], sizes = [1, 32], strides = [1, 1]} : vector<14x32xf32> to vector<1x32xf32>
    %31 = vector.shape_cast %30 : vector<1x32xf32> to vector<32xf32>
    %32 = vector.shape_cast %31 : vector<32xf32> to vector<1x32xf32>
    %33 = vector.broadcast %32 : vector<1x32xf32> to vector<8x32xf32>
    %34 = arith.addf %29, %33 : vector<8x32xf32>
    %35 = arith.subf %26, %34 : vector<8x32xf32>
    %c0_16 = arith.constant 0 : index
    %c0_17 = arith.constant 0 : index
    %c0_18 = arith.constant 0 : index
    %36 = vector.load %arg2[%c0_16, %c0_17, %c0_18] : memref<4x32x32xf32, #tpu.memory_space<vmem>>, vector<1x32x32xf32>
    %37 = vector.shape_cast %36 : vector<1x32x32xf32> to vector<32x32xf32>
    %c0_19 = arith.constant 0 : index
    %c0_20 = arith.constant 0 : index
    %c0_21 = arith.constant 0 : index
    %38 = vector.load %arg3[%c0_19, %c0_20, %c0_21] : memref<4x8x8xf32, #tpu.memory_space<vmem>>, vector<1x8x8xf32>
    %39 = vector.shape_cast %38 : vector<1x8x8xf32> to vector<8x8xf32>
    %40 = vector.extract_strided_slice %1 {offsets = [2, 0], sizes = [1, 32], strides = [1, 1]} : vector<14x32xf32> to vector<1x32xf32>
    %41 = vector.shape_cast %40 : vector<1x32xf32> to vector<32xf32>
    %42 = vector.extract_strided_slice %1 {offsets = [3, 0], sizes = [1, 32], strides = [1, 1]} : vector<14x32xf32> to vector<1x32xf32>
    %43 = vector.shape_cast %42 : vector<1x32xf32> to vector<32xf32>
    %44 = vector.extract_strided_slice %1 {offsets = [4, 0], sizes = [1, 32], strides = [1, 1]} : vector<14x32xf32> to vector<1x32xf32>
    %45 = vector.shape_cast %44 : vector<1x32xf32> to vector<32xf32>
    %46 = vector.extract_strided_slice %2 {offsets = [0, 0], sizes = [1, 8], strides = [1, 1]} : vector<4x8xf32> to vector<1x8xf32>
    %47 = vector.shape_cast %46 : vector<1x8xf32> to vector<8xf32>
    %48 = vector.shape_cast %47 : vector<8xf32> to vector<8x1xf32>
    %cst_22 = arith.constant dense<0.000000e+00> : vector<8x32xf32>
    %49 = tpu.matmul %35, %37, %cst_22 {dimension_numbers = #tpu.dot_dimension_numbers<[1], [0], [0], [1], [0, 0, 1, 1], [], []>} : vector<8x32xf32>, vector<32x32xf32>, vector<8x32xf32> -> vector<8x32xf32>
    %50 = vector.shape_cast %41 : vector<32xf32> to vector<1x32xf32>
    %51 = vector.broadcast %50 : vector<1x32xf32> to vector<8x32xf32>
    %52 = arith.addf %49, %51 : vector<8x32xf32>
    %cst_23 = arith.constant 5.000000e-01 : f32
    %53 = vector.broadcast %cst_23 : f32 to vector<8x32xf32>
    %54 = arith.mulf %53, %52 : vector<8x32xf32>
    %cst_24 = arith.constant 0.707106769 : f32
    %55 = vector.broadcast %cst_24 : f32 to vector<8x32xf32>
    %56 = arith.mulf %52, %55 : vector<8x32xf32>
    %57 = math.erf %56 : vector<8x32xf32>
    %cst_25 = arith.constant 1.000000e+00 : f32
    %58 = vector.broadcast %cst_25 : f32 to vector<8x32xf32>
    %59 = arith.addf %58, %57 : vector<8x32xf32>
    %60 = arith.mulf %54, %59 : vector<8x32xf32>
    %61 = arith.addf %60, %35 : vector<8x32xf32>
    %cst_26 = arith.constant dense<0.000000e+00> : vector<8xf32>
    %62 = vector.multi_reduction <add>, %61, %cst_26 [1] : vector<8x32xf32> to vector<8xf32>
    %63 = vector.shape_cast %62 : vector<8xf32> to vector<8x1xf32>
    %cst_27 = arith.constant 3.200000e+01 : f32
    %64 = vector.broadcast %cst_27 : f32 to vector<8x1xf32>
    %65 = arith.divf %63, %64 : vector<8x1xf32>
    %66 = vector.broadcast %65 : vector<8x1xf32> to vector<8x32xf32>
    %67 = arith.subf %61, %66 : vector<8x32xf32>
    %68 = vector.broadcast %65 : vector<8x1xf32> to vector<8x32xf32>
    %69 = arith.subf %61, %68 : vector<8x32xf32>
    %70 = arith.mulf %67, %69 : vector<8x32xf32>
    %cst_28 = arith.constant dense<0.000000e+00> : vector<8xf32>
    %71 = vector.multi_reduction <add>, %70, %cst_28 [1] : vector<8x32xf32> to vector<8xf32>
    %72 = vector.shape_cast %71 : vector<8xf32> to vector<8x1xf32>
    %cst_29 = arith.constant 3.200000e+01 : f32
    %73 = vector.broadcast %cst_29 : f32 to vector<8x1xf32>
    %74 = arith.divf %72, %73 : vector<8x1xf32>
    %75 = vector.broadcast %65 : vector<8x1xf32> to vector<8x32xf32>
    %76 = arith.subf %61, %75 : vector<8x32xf32>
    %cst_30 = arith.constant 9.99999974E-6 : f32
    %77 = vector.broadcast %cst_30 : f32 to vector<8x1xf32>
    %78 = arith.addf %74, %77 : vector<8x1xf32>
    %79 = math.rsqrt %78 : vector<8x1xf32>
    %80 = vector.broadcast %79 : vector<8x1xf32> to vector<8x32xf32>
    %81 = arith.mulf %76, %80 : vector<8x32xf32>
    %82 = vector.shape_cast %43 : vector<32xf32> to vector<1x32xf32>
    %83 = vector.broadcast %82 : vector<1x32xf32> to vector<8x32xf32>
    %84 = arith.mulf %81, %83 : vector<8x32xf32>
    %85 = vector.shape_cast %45 : vector<32xf32> to vector<1x32xf32>
    %86 = vector.broadcast %85 : vector<1x32xf32> to vector<8x32xf32>
    %87 = arith.addf %84, %86 : vector<8x32xf32>
    %cst_31 = arith.constant dense<0.000000e+00> : vector<8x32xf32>
    %88 = tpu.matmul %39, %87, %cst_31 {dimension_numbers = #tpu.dot_dimension_numbers<[1], [0], [0], [1], [0, 0, 1, 1], [], []>} : vector<8x8xf32>, vector<8x32xf32>, vector<8x32xf32> -> vector<8x32xf32>
    %89 = vector.broadcast %48 : vector<8x1xf32> to vector<8x32xf32>
    %90 = arith.addf %88, %89 : vector<8x32xf32>
    %cst_32 = arith.constant 5.000000e-01 : f32
    %91 = vector.broadcast %cst_32 : f32 to vector<8x32xf32>
    %92 = arith.mulf %91, %90 : vector<8x32xf32>
    %cst_33 = arith.constant 0.707106769 : f32
    %93 = vector.broadcast %cst_33 : f32 to vector<8x32xf32>
    %94 = arith.mulf %90, %93 : vector<8x32xf32>
    %95 = math.erf %94 : vector<8x32xf32>
    %cst_34 = arith.constant 1.000000e+00 : f32
    %96 = vector.broadcast %cst_34 : f32 to vector<8x32xf32>
    %97 = arith.addf %96, %95 : vector<8x32xf32>
    %98 = arith.mulf %92, %97 : vector<8x32xf32>
    %99 = arith.mulf %98, %87 : vector<8x32xf32>
    %100 = arith.addf %99, %35 : vector<8x32xf32>
    %cst_35 = arith.constant dense<0.000000e+00> : vector<8xf32>
    %101 = vector.multi_reduction <add>, %100, %cst_35 [1] : vector<8x32xf32> to vector<8xf32>
    %102 = vector.shape_cast %101 : vector<8xf32> to vector<8x1xf32>
    %cst_36 = arith.constant 3.200000e+01 : f32
    %103 = vector.broadcast %cst_36 : f32 to vector<8x1xf32>
    %104 = arith.divf %102, %103 : vector<8x1xf32>
    %105 = vector.broadcast %104 : vector<8x1xf32> to vector<8x32xf32>
    %106 = arith.subf %100, %105 : vector<8x32xf32>
    %107 = vector.broadcast %104 : vector<8x1xf32> to vector<8x32xf32>
    %108 = arith.subf %100, %107 : vector<8x32xf32>
    %109 = arith.mulf %106, %108 : vector<8x32xf32>
    %cst_37 = arith.constant dense<0.000000e+00> : vector<8xf32>
    %110 = vector.multi_reduction <add>, %109, %cst_37 [1] : vector<8x32xf32> to vector<8xf32>
    %111 = vector.shape_cast %110 : vector<8xf32> to vector<8x1xf32>
    %cst_38 = arith.constant 3.200000e+01 : f32
    %112 = vector.broadcast %cst_38 : f32 to vector<8x1xf32>
    %113 = arith.divf %111, %112 : vector<8x1xf32>
    %114 = vector.broadcast %104 : vector<8x1xf32> to vector<8x32xf32>
    %115 = arith.subf %100, %114 : vector<8x32xf32>
    %cst_39 = arith.constant 9.99999974E-6 : f32
    %116 = vector.broadcast %cst_39 : f32 to vector<8x1xf32>
    %117 = arith.addf %113, %116 : vector<8x1xf32>
    %118 = math.rsqrt %117 : vector<8x1xf32>
    %119 = vector.broadcast %118 : vector<8x1xf32> to vector<8x32xf32>
    %120 = arith.mulf %115, %119 : vector<8x32xf32>
    %121 = vector.shape_cast %43 : vector<32xf32> to vector<1x32xf32>
    %122 = vector.broadcast %121 : vector<1x32xf32> to vector<8x32xf32>
    %123 = arith.mulf %120, %122 : vector<8x32xf32>
    %124 = vector.shape_cast %45 : vector<32xf32> to vector<1x32xf32>
    %125 = vector.broadcast %124 : vector<1x32xf32> to vector<8x32xf32>
    %126 = arith.addf %123, %125 : vector<8x32xf32>
    %c2 = arith.constant 2 : index
    %c0_40 = arith.constant 0 : index
    %c0_41 = arith.constant 0 : index
    %127 = vector.load %arg2[%c2, %c0_40, %c0_41] : memref<4x32x32xf32, #tpu.memory_space<vmem>>, vector<1x32x32xf32>
    %128 = vector.shape_cast %127 : vector<1x32x32xf32> to vector<32x32xf32>
    %c2_42 = arith.constant 2 : index
    %c0_43 = arith.constant 0 : index
    %c0_44 = arith.constant 0 : index
    %129 = vector.load %arg3[%c2_42, %c0_43, %c0_44] : memref<4x8x8xf32, #tpu.memory_space<vmem>>, vector<1x8x8xf32>
    %130 = vector.shape_cast %129 : vector<1x8x8xf32> to vector<8x8xf32>
    %131 = vector.extract_strided_slice %1 {offsets = [8, 0], sizes = [1, 32], strides = [1, 1]} : vector<14x32xf32> to vector<1x32xf32>
    %132 = vector.shape_cast %131 : vector<1x32xf32> to vector<32xf32>
    %133 = vector.extract_strided_slice %1 {offsets = [9, 0], sizes = [1, 32], strides = [1, 1]} : vector<14x32xf32> to vector<1x32xf32>
    %134 = vector.shape_cast %133 : vector<1x32xf32> to vector<32xf32>
    %135 = vector.extract_strided_slice %1 {offsets = [10, 0], sizes = [1, 32], strides = [1, 1]} : vector<14x32xf32> to vector<1x32xf32>
    %136 = vector.shape_cast %135 : vector<1x32xf32> to vector<32xf32>
    %137 = vector.extract_strided_slice %2 {offsets = [2, 0], sizes = [1, 8], strides = [1, 1]} : vector<4x8xf32> to vector<1x8xf32>
    %138 = vector.shape_cast %137 : vector<1x8xf32> to vector<8xf32>
    %139 = vector.shape_cast %138 : vector<8xf32> to vector<8x1xf32>
    %cst_45 = arith.constant dense<0.000000e+00> : vector<8x32xf32>
    %140 = tpu.matmul %34, %128, %cst_45 {dimension_numbers = #tpu.dot_dimension_numbers<[1], [0], [0], [1], [0, 0, 1, 1], [], []>} : vector<8x32xf32>, vector<32x32xf32>, vector<8x32xf32> -> vector<8x32xf32>
    %141 = vector.shape_cast %132 : vector<32xf32> to vector<1x32xf32>
    %142 = vector.broadcast %141 : vector<1x32xf32> to vector<8x32xf32>
    %143 = arith.addf %140, %142 : vector<8x32xf32>
    %cst_46 = arith.constant 5.000000e-01 : f32
    %144 = vector.broadcast %cst_46 : f32 to vector<8x32xf32>
    %145 = arith.mulf %144, %143 : vector<8x32xf32>
    %cst_47 = arith.constant 0.707106769 : f32
    %146 = vector.broadcast %cst_47 : f32 to vector<8x32xf32>
    %147 = arith.mulf %143, %146 : vector<8x32xf32>
    %148 = math.erf %147 : vector<8x32xf32>
    %cst_48 = arith.constant 1.000000e+00 : f32
    %149 = vector.broadcast %cst_48 : f32 to vector<8x32xf32>
    %150 = arith.addf %149, %148 : vector<8x32xf32>
    %151 = arith.mulf %145, %150 : vector<8x32xf32>
    %152 = arith.addf %151, %34 : vector<8x32xf32>
    %cst_49 = arith.constant dense<0.000000e+00> : vector<8xf32>
    %153 = vector.multi_reduction <add>, %152, %cst_49 [1] : vector<8x32xf32> to vector<8xf32>
    %154 = vector.shape_cast %153 : vector<8xf32> to vector<8x1xf32>
    %cst_50 = arith.constant 3.200000e+01 : f32
    %155 = vector.broadcast %cst_50 : f32 to vector<8x1xf32>
    %156 = arith.divf %154, %155 : vector<8x1xf32>
    %157 = vector.broadcast %156 : vector<8x1xf32> to vector<8x32xf32>
    %158 = arith.subf %152, %157 : vector<8x32xf32>
    %159 = vector.broadcast %156 : vector<8x1xf32> to vector<8x32xf32>
    %160 = arith.subf %152, %159 : vector<8x32xf32>
    %161 = arith.mulf %158, %160 : vector<8x32xf32>
    %cst_51 = arith.constant dense<0.000000e+00> : vector<8xf32>
    %162 = vector.multi_reduction <add>, %161, %cst_51 [1] : vector<8x32xf32> to vector<8xf32>
    %163 = vector.shape_cast %162 : vector<8xf32> to vector<8x1xf32>
    %cst_52 = arith.constant 3.200000e+01 : f32
    %164 = vector.broadcast %cst_52 : f32 to vector<8x1xf32>
    %165 = arith.divf %163, %164 : vector<8x1xf32>
    %166 = vector.broadcast %156 : vector<8x1xf32> to vector<8x32xf32>
    %167 = arith.subf %152, %166 : vector<8x32xf32>
    %cst_53 = arith.constant 9.99999974E-6 : f32
    %168 = vector.broadcast %cst_53 : f32 to vector<8x1xf32>
    %169 = arith.addf %165, %168 : vector<8x1xf32>
    %170 = math.rsqrt %169 : vector<8x1xf32>
    %171 = vector.broadcast %170 : vector<8x1xf32> to vector<8x32xf32>
    %172 = arith.mulf %167, %171 : vector<8x32xf32>
    %173 = vector.shape_cast %134 : vector<32xf32> to vector<1x32xf32>
    %174 = vector.broadcast %173 : vector<1x32xf32> to vector<8x32xf32>
    %175 = arith.mulf %172, %174 : vector<8x32xf32>
    %176 = vector.shape_cast %136 : vector<32xf32> to vector<1x32xf32>
    %177 = vector.broadcast %176 : vector<1x32xf32> to vector<8x32xf32>
    %178 = arith.addf %175, %177 : vector<8x32xf32>
    %cst_54 = arith.constant dense<0.000000e+00> : vector<8x32xf32>
    %179 = tpu.matmul %130, %178, %cst_54 {dimension_numbers = #tpu.dot_dimension_numbers<[1], [0], [0], [1], [0, 0, 1, 1], [], []>} : vector<8x8xf32>, vector<8x32xf32>, vector<8x32xf32> -> vector<8x32xf32>
    %180 = vector.broadcast %139 : vector<8x1xf32> to vector<8x32xf32>
    %181 = arith.addf %179, %180 : vector<8x32xf32>
    %cst_55 = arith.constant 5.000000e-01 : f32
    %182 = vector.broadcast %cst_55 : f32 to vector<8x32xf32>
    %183 = arith.mulf %182, %181 : vector<8x32xf32>
    %cst_56 = arith.constant 0.707106769 : f32
    %184 = vector.broadcast %cst_56 : f32 to vector<8x32xf32>
    %185 = arith.mulf %181, %184 : vector<8x32xf32>
    %186 = math.erf %185 : vector<8x32xf32>
    %cst_57 = arith.constant 1.000000e+00 : f32
    %187 = vector.broadcast %cst_57 : f32 to vector<8x32xf32>
    %188 = arith.addf %187, %186 : vector<8x32xf32>
    %189 = arith.mulf %183, %188 : vector<8x32xf32>
    %190 = arith.mulf %189, %178 : vector<8x32xf32>
    %191 = arith.addf %190, %34 : vector<8x32xf32>
    %cst_58 = arith.constant dense<0.000000e+00> : vector<8xf32>
    %192 = vector.multi_reduction <add>, %191, %cst_58 [1] : vector<8x32xf32> to vector<8xf32>
    %193 = vector.shape_cast %192 : vector<8xf32> to vector<8x1xf32>
    %cst_59 = arith.constant 3.200000e+01 : f32
    %194 = vector.broadcast %cst_59 : f32 to vector<8x1xf32>
    %195 = arith.divf %193, %194 : vector<8x1xf32>
    %196 = vector.broadcast %195 : vector<8x1xf32> to vector<8x32xf32>
    %197 = arith.subf %191, %196 : vector<8x32xf32>
    %198 = vector.broadcast %195 : vector<8x1xf32> to vector<8x32xf32>
    %199 = arith.subf %191, %198 : vector<8x32xf32>
    %200 = arith.mulf %197, %199 : vector<8x32xf32>
    %cst_60 = arith.constant dense<0.000000e+00> : vector<8xf32>
    %201 = vector.multi_reduction <add>, %200, %cst_60 [1] : vector<8x32xf32> to vector<8xf32>
    %202 = vector.shape_cast %201 : vector<8xf32> to vector<8x1xf32>
    %cst_61 = arith.constant 3.200000e+01 : f32
    %203 = vector.broadcast %cst_61 : f32 to vector<8x1xf32>
    %204 = arith.divf %202, %203 : vector<8x1xf32>
    %205 = vector.broadcast %195 : vector<8x1xf32> to vector<8x32xf32>
    %206 = arith.subf %191, %205 : vector<8x32xf32>
    %cst_62 = arith.constant 9.99999974E-6 : f32
    %207 = vector.broadcast %cst_62 : f32 to vector<8x1xf32>
    %208 = arith.addf %204, %207 : vector<8x1xf32>
    %209 = math.rsqrt %208 : vector<8x1xf32>
    %210 = vector.broadcast %209 : vector<8x1xf32> to vector<8x32xf32>
    %211 = arith.mulf %206, %210 : vector<8x32xf32>
    %212 = vector.shape_cast %134 : vector<32xf32> to vector<1x32xf32>
    %213 = vector.broadcast %212 : vector<1x32xf32> to vector<8x32xf32>
    %214 = arith.mulf %211, %213 : vector<8x32xf32>
    %215 = vector.shape_cast %136 : vector<32xf32> to vector<1x32xf32>
    %216 = vector.broadcast %215 : vector<1x32xf32> to vector<8x32xf32>
    %217 = arith.addf %214, %216 : vector<8x32xf32>
    %c1_63 = arith.constant 1 : index
    %c0_64 = arith.constant 0 : index
    %c0_65 = arith.constant 0 : index
    %218 = vector.load %arg2[%c1_63, %c0_64, %c0_65] : memref<4x32x32xf32, #tpu.memory_space<vmem>>, vector<1x32x32xf32>
    %219 = vector.shape_cast %218 : vector<1x32x32xf32> to vector<32x32xf32>
    %c1_66 = arith.constant 1 : index
    %c0_67 = arith.constant 0 : index
    %c0_68 = arith.constant 0 : index
    %220 = vector.load %arg3[%c1_66, %c0_67, %c0_68] : memref<4x8x8xf32, #tpu.memory_space<vmem>>, vector<1x8x8xf32>
    %221 = vector.shape_cast %220 : vector<1x8x8xf32> to vector<8x8xf32>
    %222 = vector.extract_strided_slice %1 {offsets = [5, 0], sizes = [1, 32], strides = [1, 1]} : vector<14x32xf32> to vector<1x32xf32>
    %223 = vector.shape_cast %222 : vector<1x32xf32> to vector<32xf32>
    %224 = vector.extract_strided_slice %1 {offsets = [6, 0], sizes = [1, 32], strides = [1, 1]} : vector<14x32xf32> to vector<1x32xf32>
    %225 = vector.shape_cast %224 : vector<1x32xf32> to vector<32xf32>
    %226 = vector.extract_strided_slice %1 {offsets = [7, 0], sizes = [1, 32], strides = [1, 1]} : vector<14x32xf32> to vector<1x32xf32>
    %227 = vector.shape_cast %226 : vector<1x32xf32> to vector<32xf32>
    %228 = vector.extract_strided_slice %2 {offsets = [1, 0], sizes = [1, 8], strides = [1, 1]} : vector<4x8xf32> to vector<1x8xf32>
    %229 = vector.shape_cast %228 : vector<1x8xf32> to vector<8xf32>
    %230 = vector.shape_cast %229 : vector<8xf32> to vector<8x1xf32>
    %cst_69 = arith.constant dense<0.000000e+00> : vector<8x32xf32>
    %231 = tpu.matmul %126, %219, %cst_69 {dimension_numbers = #tpu.dot_dimension_numbers<[1], [0], [0], [1], [0, 0, 1, 1], [], []>} : vector<8x32xf32>, vector<32x32xf32>, vector<8x32xf32> -> vector<8x32xf32>
    %232 = vector.shape_cast %223 : vector<32xf32> to vector<1x32xf32>
    %233 = vector.broadcast %232 : vector<1x32xf32> to vector<8x32xf32>
    %234 = arith.addf %231, %233 : vector<8x32xf32>
    %cst_70 = arith.constant 5.000000e-01 : f32
    %235 = vector.broadcast %cst_70 : f32 to vector<8x32xf32>
    %236 = arith.mulf %235, %234 : vector<8x32xf32>
    %cst_71 = arith.constant 0.707106769 : f32
    %237 = vector.broadcast %cst_71 : f32 to vector<8x32xf32>
    %238 = arith.mulf %234, %237 : vector<8x32xf32>
    %239 = math.erf %238 : vector<8x32xf32>
    %cst_72 = arith.constant 1.000000e+00 : f32
    %240 = vector.broadcast %cst_72 : f32 to vector<8x32xf32>
    %241 = arith.addf %240, %239 : vector<8x32xf32>
    %242 = arith.mulf %236, %241 : vector<8x32xf32>
    %243 = arith.addf %242, %126 : vector<8x32xf32>
    %cst_73 = arith.constant dense<0.000000e+00> : vector<8xf32>
    %244 = vector.multi_reduction <add>, %243, %cst_73 [1] : vector<8x32xf32> to vector<8xf32>
    %245 = vector.shape_cast %244 : vector<8xf32> to vector<8x1xf32>
    %cst_74 = arith.constant 3.200000e+01 : f32
    %246 = vector.broadcast %cst_74 : f32 to vector<8x1xf32>
    %247 = arith.divf %245, %246 : vector<8x1xf32>
    %248 = vector.broadcast %247 : vector<8x1xf32> to vector<8x32xf32>
    %249 = arith.subf %243, %248 : vector<8x32xf32>
    %250 = vector.broadcast %247 : vector<8x1xf32> to vector<8x32xf32>
    %251 = arith.subf %243, %250 : vector<8x32xf32>
    %252 = arith.mulf %249, %251 : vector<8x32xf32>
    %cst_75 = arith.constant dense<0.000000e+00> : vector<8xf32>
    %253 = vector.multi_reduction <add>, %252, %cst_75 [1] : vector<8x32xf32> to vector<8xf32>
    %254 = vector.shape_cast %253 : vector<8xf32> to vector<8x1xf32>
    %cst_76 = arith.constant 3.200000e+01 : f32
    %255 = vector.broadcast %cst_76 : f32 to vector<8x1xf32>
    %256 = arith.divf %254, %255 : vector<8x1xf32>
    %257 = vector.broadcast %247 : vector<8x1xf32> to vector<8x32xf32>
    %258 = arith.subf %243, %257 : vector<8x32xf32>
    %cst_77 = arith.constant 9.99999974E-6 : f32
    %259 = vector.broadcast %cst_77 : f32 to vector<8x1xf32>
    %260 = arith.addf %256, %259 : vector<8x1xf32>
    %261 = math.rsqrt %260 : vector<8x1xf32>
    %262 = vector.broadcast %261 : vector<8x1xf32> to vector<8x32xf32>
    %263 = arith.mulf %258, %262 : vector<8x32xf32>
    %264 = vector.shape_cast %225 : vector<32xf32> to vector<1x32xf32>
    %265 = vector.broadcast %264 : vector<1x32xf32> to vector<8x32xf32>
    %266 = arith.mulf %263, %265 : vector<8x32xf32>
    %267 = vector.shape_cast %227 : vector<32xf32> to vector<1x32xf32>
    %268 = vector.broadcast %267 : vector<1x32xf32> to vector<8x32xf32>
    %269 = arith.addf %266, %268 : vector<8x32xf32>
    %cst_78 = arith.constant dense<0.000000e+00> : vector<8x32xf32>
    %270 = tpu.matmul %221, %269, %cst_78 {dimension_numbers = #tpu.dot_dimension_numbers<[1], [0], [0], [1], [0, 0, 1, 1], [], []>} : vector<8x8xf32>, vector<8x32xf32>, vector<8x32xf32> -> vector<8x32xf32>
    %271 = vector.broadcast %230 : vector<8x1xf32> to vector<8x32xf32>
    %272 = arith.addf %270, %271 : vector<8x32xf32>
    %cst_79 = arith.constant 5.000000e-01 : f32
    %273 = vector.broadcast %cst_79 : f32 to vector<8x32xf32>
    %274 = arith.mulf %273, %272 : vector<8x32xf32>
    %cst_80 = arith.constant 0.707106769 : f32
    %275 = vector.broadcast %cst_80 : f32 to vector<8x32xf32>
    %276 = arith.mulf %272, %275 : vector<8x32xf32>
    %277 = math.erf %276 : vector<8x32xf32>
    %cst_81 = arith.constant 1.000000e+00 : f32
    %278 = vector.broadcast %cst_81 : f32 to vector<8x32xf32>
    %279 = arith.addf %278, %277 : vector<8x32xf32>
    %280 = arith.mulf %274, %279 : vector<8x32xf32>
    %281 = arith.mulf %280, %269 : vector<8x32xf32>
    %282 = arith.addf %281, %126 : vector<8x32xf32>
    %cst_82 = arith.constant dense<0.000000e+00> : vector<8xf32>
    %283 = vector.multi_reduction <add>, %282, %cst_82 [1] : vector<8x32xf32> to vector<8xf32>
    %284 = vector.shape_cast %283 : vector<8xf32> to vector<8x1xf32>
    %cst_83 = arith.constant 3.200000e+01 : f32
    %285 = vector.broadcast %cst_83 : f32 to vector<8x1xf32>
    %286 = arith.divf %284, %285 : vector<8x1xf32>
    %287 = vector.broadcast %286 : vector<8x1xf32> to vector<8x32xf32>
    %288 = arith.subf %282, %287 : vector<8x32xf32>
    %289 = vector.broadcast %286 : vector<8x1xf32> to vector<8x32xf32>
    %290 = arith.subf %282, %289 : vector<8x32xf32>
    %291 = arith.mulf %288, %290 : vector<8x32xf32>
    %cst_84 = arith.constant dense<0.000000e+00> : vector<8xf32>
    %292 = vector.multi_reduction <add>, %291, %cst_84 [1] : vector<8x32xf32> to vector<8xf32>
    %293 = vector.shape_cast %292 : vector<8xf32> to vector<8x1xf32>
    %cst_85 = arith.constant 3.200000e+01 : f32
    %294 = vector.broadcast %cst_85 : f32 to vector<8x1xf32>
    %295 = arith.divf %293, %294 : vector<8x1xf32>
    %296 = vector.broadcast %286 : vector<8x1xf32> to vector<8x32xf32>
    %297 = arith.subf %282, %296 : vector<8x32xf32>
    %cst_86 = arith.constant 9.99999974E-6 : f32
    %298 = vector.broadcast %cst_86 : f32 to vector<8x1xf32>
    %299 = arith.addf %295, %298 : vector<8x1xf32>
    %300 = math.rsqrt %299 : vector<8x1xf32>
    %301 = vector.broadcast %300 : vector<8x1xf32> to vector<8x32xf32>
    %302 = arith.mulf %297, %301 : vector<8x32xf32>
    %303 = vector.shape_cast %225 : vector<32xf32> to vector<1x32xf32>
    %304 = vector.broadcast %303 : vector<1x32xf32> to vector<8x32xf32>
    %305 = arith.mulf %302, %304 : vector<8x32xf32>
    %306 = vector.shape_cast %227 : vector<32xf32> to vector<1x32xf32>
    %307 = vector.broadcast %306 : vector<1x32xf32> to vector<8x32xf32>
    %308 = arith.addf %305, %307 : vector<8x32xf32>
    %c3 = arith.constant 3 : index
    %c0_87 = arith.constant 0 : index
    %c0_88 = arith.constant 0 : index
    %309 = vector.load %arg2[%c3, %c0_87, %c0_88] : memref<4x32x32xf32, #tpu.memory_space<vmem>>, vector<1x32x32xf32>
    %310 = vector.shape_cast %309 : vector<1x32x32xf32> to vector<32x32xf32>
    %c3_89 = arith.constant 3 : index
    %c0_90 = arith.constant 0 : index
    %c0_91 = arith.constant 0 : index
    %311 = vector.load %arg3[%c3_89, %c0_90, %c0_91] : memref<4x8x8xf32, #tpu.memory_space<vmem>>, vector<1x8x8xf32>
    %312 = vector.shape_cast %311 : vector<1x8x8xf32> to vector<8x8xf32>
    %313 = vector.extract_strided_slice %1 {offsets = [11, 0], sizes = [1, 32], strides = [1, 1]} : vector<14x32xf32> to vector<1x32xf32>
    %314 = vector.shape_cast %313 : vector<1x32xf32> to vector<32xf32>
    %315 = vector.extract_strided_slice %1 {offsets = [12, 0], sizes = [1, 32], strides = [1, 1]} : vector<14x32xf32> to vector<1x32xf32>
    %316 = vector.shape_cast %315 : vector<1x32xf32> to vector<32xf32>
    %317 = vector.extract_strided_slice %1 {offsets = [13, 0], sizes = [1, 32], strides = [1, 1]} : vector<14x32xf32> to vector<1x32xf32>
    %318 = vector.shape_cast %317 : vector<1x32xf32> to vector<32xf32>
    %319 = vector.extract_strided_slice %2 {offsets = [3, 0], sizes = [1, 8], strides = [1, 1]} : vector<4x8xf32> to vector<1x8xf32>
    %320 = vector.shape_cast %319 : vector<1x8xf32> to vector<8xf32>
    %321 = vector.shape_cast %320 : vector<8xf32> to vector<8x1xf32>
    %cst_92 = arith.constant dense<0.000000e+00> : vector<8x32xf32>
    %322 = tpu.matmul %217, %310, %cst_92 {dimension_numbers = #tpu.dot_dimension_numbers<[1], [0], [0], [1], [0, 0, 1, 1], [], []>} : vector<8x32xf32>, vector<32x32xf32>, vector<8x32xf32> -> vector<8x32xf32>
    %323 = vector.shape_cast %314 : vector<32xf32> to vector<1x32xf32>
    %324 = vector.broadcast %323 : vector<1x32xf32> to vector<8x32xf32>
    %325 = arith.addf %322, %324 : vector<8x32xf32>
    %cst_93 = arith.constant 5.000000e-01 : f32
    %326 = vector.broadcast %cst_93 : f32 to vector<8x32xf32>
    %327 = arith.mulf %326, %325 : vector<8x32xf32>
    %cst_94 = arith.constant 0.707106769 : f32
    %328 = vector.broadcast %cst_94 : f32 to vector<8x32xf32>
    %329 = arith.mulf %325, %328 : vector<8x32xf32>
    %330 = math.erf %329 : vector<8x32xf32>
    %cst_95 = arith.constant 1.000000e+00 : f32
    %331 = vector.broadcast %cst_95 : f32 to vector<8x32xf32>
    %332 = arith.addf %331, %330 : vector<8x32xf32>
    %333 = arith.mulf %327, %332 : vector<8x32xf32>
    %334 = arith.addf %333, %217 : vector<8x32xf32>
    %cst_96 = arith.constant dense<0.000000e+00> : vector<8xf32>
    %335 = vector.multi_reduction <add>, %334, %cst_96 [1] : vector<8x32xf32> to vector<8xf32>
    %336 = vector.shape_cast %335 : vector<8xf32> to vector<8x1xf32>
    %cst_97 = arith.constant 3.200000e+01 : f32
    %337 = vector.broadcast %cst_97 : f32 to vector<8x1xf32>
    %338 = arith.divf %336, %337 : vector<8x1xf32>
    %339 = vector.broadcast %338 : vector<8x1xf32> to vector<8x32xf32>
    %340 = arith.subf %334, %339 : vector<8x32xf32>
    %341 = vector.broadcast %338 : vector<8x1xf32> to vector<8x32xf32>
    %342 = arith.subf %334, %341 : vector<8x32xf32>
    %343 = arith.mulf %340, %342 : vector<8x32xf32>
    %cst_98 = arith.constant dense<0.000000e+00> : vector<8xf32>
    %344 = vector.multi_reduction <add>, %343, %cst_98 [1] : vector<8x32xf32> to vector<8xf32>
    %345 = vector.shape_cast %344 : vector<8xf32> to vector<8x1xf32>
    %cst_99 = arith.constant 3.200000e+01 : f32
    %346 = vector.broadcast %cst_99 : f32 to vector<8x1xf32>
    %347 = arith.divf %345, %346 : vector<8x1xf32>
    %348 = vector.broadcast %338 : vector<8x1xf32> to vector<8x32xf32>
    %349 = arith.subf %334, %348 : vector<8x32xf32>
    %cst_100 = arith.constant 9.99999974E-6 : f32
    %350 = vector.broadcast %cst_100 : f32 to vector<8x1xf32>
    %351 = arith.addf %347, %350 : vector<8x1xf32>
    %352 = math.rsqrt %351 : vector<8x1xf32>
    %353 = vector.broadcast %352 : vector<8x1xf32> to vector<8x32xf32>
    %354 = arith.mulf %349, %353 : vector<8x32xf32>
    %355 = vector.shape_cast %316 : vector<32xf32> to vector<1x32xf32>
    %356 = vector.broadcast %355 : vector<1x32xf32> to vector<8x32xf32>
    %357 = arith.mulf %354, %356 : vector<8x32xf32>
    %358 = vector.shape_cast %318 : vector<32xf32> to vector<1x32xf32>
    %359 = vector.broadcast %358 : vector<1x32xf32> to vector<8x32xf32>
    %360 = arith.addf %357, %359 : vector<8x32xf32>
    %cst_101 = arith.constant dense<0.000000e+00> : vector<8x32xf32>
    %361 = tpu.matmul %312, %360, %cst_101 {dimension_numbers = #tpu.dot_dimension_numbers<[1], [0], [0], [1], [0, 0, 1, 1], [], []>} : vector<8x8xf32>, vector<8x32xf32>, vector<8x32xf32> -> vector<8x32xf32>
    %362 = vector.broadcast %321 : vector<8x1xf32> to vector<8x32xf32>
    %363 = arith.addf %361, %362 : vector<8x32xf32>
    %cst_102 = arith.constant 5.000000e-01 : f32
    %364 = vector.broadcast %cst_102 : f32 to vector<8x32xf32>
    %365 = arith.mulf %364, %363 : vector<8x32xf32>
    %cst_103 = arith.constant 0.707106769 : f32
    %366 = vector.broadcast %cst_103 : f32 to vector<8x32xf32>
    %367 = arith.mulf %363, %366 : vector<8x32xf32>
    %368 = math.erf %367 : vector<8x32xf32>
    %cst_104 = arith.constant 1.000000e+00 : f32
    %369 = vector.broadcast %cst_104 : f32 to vector<8x32xf32>
    %370 = arith.addf %369, %368 : vector<8x32xf32>
    %371 = arith.mulf %365, %370 : vector<8x32xf32>
    %372 = arith.mulf %371, %360 : vector<8x32xf32>
    %373 = arith.addf %372, %217 : vector<8x32xf32>
    %cst_105 = arith.constant dense<0.000000e+00> : vector<8xf32>
    %374 = vector.multi_reduction <add>, %373, %cst_105 [1] : vector<8x32xf32> to vector<8xf32>
    %375 = vector.shape_cast %374 : vector<8xf32> to vector<8x1xf32>
    %cst_106 = arith.constant 3.200000e+01 : f32
    %376 = vector.broadcast %cst_106 : f32 to vector<8x1xf32>
    %377 = arith.divf %375, %376 : vector<8x1xf32>
    %378 = vector.broadcast %377 : vector<8x1xf32> to vector<8x32xf32>
    %379 = arith.subf %373, %378 : vector<8x32xf32>
    %380 = vector.broadcast %377 : vector<8x1xf32> to vector<8x32xf32>
    %381 = arith.subf %373, %380 : vector<8x32xf32>
    %382 = arith.mulf %379, %381 : vector<8x32xf32>
    %cst_107 = arith.constant dense<0.000000e+00> : vector<8xf32>
    %383 = vector.multi_reduction <add>, %382, %cst_107 [1] : vector<8x32xf32> to vector<8xf32>
    %384 = vector.shape_cast %383 : vector<8xf32> to vector<8x1xf32>
    %cst_108 = arith.constant 3.200000e+01 : f32
    %385 = vector.broadcast %cst_108 : f32 to vector<8x1xf32>
    %386 = arith.divf %384, %385 : vector<8x1xf32>
    %387 = vector.broadcast %377 : vector<8x1xf32> to vector<8x32xf32>
    %388 = arith.subf %373, %387 : vector<8x32xf32>
    %cst_109 = arith.constant 9.99999974E-6 : f32
    %389 = vector.broadcast %cst_109 : f32 to vector<8x1xf32>
    %390 = arith.addf %386, %389 : vector<8x1xf32>
    %391 = math.rsqrt %390 : vector<8x1xf32>
    %392 = vector.broadcast %391 : vector<8x1xf32> to vector<8x32xf32>
    %393 = arith.mulf %388, %392 : vector<8x32xf32>
    %394 = vector.shape_cast %316 : vector<32xf32> to vector<1x32xf32>
    %395 = vector.broadcast %394 : vector<1x32xf32> to vector<8x32xf32>
    %396 = arith.mulf %393, %395 : vector<8x32xf32>
    %397 = vector.shape_cast %318 : vector<32xf32> to vector<1x32xf32>
    %398 = vector.broadcast %397 : vector<1x32xf32> to vector<8x32xf32>
    %399 = arith.addf %396, %398 : vector<8x32xf32>
    %400 = arith.addf %308, %399 : vector<8x32xf32>
    %c0_110 = arith.constant 0 : index
    %c0_111 = arith.constant 0 : index
    %401 = vector.load %arg6[%c0_110, %c0_111] : memref<32x8xf32, #tpu.memory_space<vmem>>, vector<32x8xf32>
    %cst_112 = arith.constant dense<0.000000e+00> : vector<8x8xf32>
    %402 = tpu.matmul %400, %401, %cst_112 {dimension_numbers = #tpu.dot_dimension_numbers<[1], [0], [0], [1], [0, 0, 1, 1], [], []>} : vector<8x32xf32>, vector<32x8xf32>, vector<8x8xf32> -> vector<8x8xf32>
    %c0_113 = arith.constant 0 : index
    %c0_114 = arith.constant 0 : index
    %403 = vector.load %arg7[%c0_113, %c0_114] : memref<1x8xf32, #tpu.memory_space<vmem>>, vector<1x8xf32>
    %404 = vector.broadcast %403 : vector<1x8xf32> to vector<8x8xf32>
    %405 = arith.addf %402, %404 : vector<8x8xf32>
    %406 = vector.broadcast %16 : vector<8x1xf32> to vector<8x8xf32>
    %407 = arith.mulf %405, %406 : vector<8x8xf32>
    %408 = vector.broadcast %6 : vector<8x1xf32> to vector<8x8xf32>
    %409 = arith.addf %407, %408 : vector<8x8xf32>
    %c0_115 = arith.constant 0 : index
    %c0_116 = arith.constant 0 : index
    %410 = vector.load %arg8[%c0_115, %c0_116] : memref<8x8xf32, #tpu.memory_space<vmem>>, vector<8x8xf32>
    tpu.vector_store %arg8[%c0_115, %c0_116], %409 {strides = array<i32>} : memref<8x8xf32, #tpu.memory_space<vmem>>, vector<8x8xf32>,
    return
  }
}

</mosaic_0001>

<bundles_post_ra>
// kernel: tpu_custom_call.1
= control target key start
LH: loop header
LB: loop body
LE: loop exit
PB: predicated region body
PF: predicated region fallthrough
CT: control target
= control target key end

     0   :  { %13 = vsyncpa [#allocation3], 0  ;;  %s1921_s0 = inlined_call_operand.hbm [shape: f32[8,16], index: 0, kind: input, shape index: {}]   ;;  %s1922_s1 = inlined_call_operand.vmem [shape: f32[2,16,32], index: 1, kind: input, shape index: {}]   ;;  %s1923_s2 = inlined_call_operand.hbm [shape: f32[4,32,32], index: 2, kind: input, shape index: {}]   ;;  %s1924_s3 = inlined_call_operand.hbm [shape: f32[4,8,8], index: 3, kind: input, shape index: {}]   ;;  %s1925_s4 = inlined_call_operand.vmem [shape: f32[14,32], index: 4, kind: input, shape index: {}]   ;;  %s1926_s5 = inlined_call_operand.hbm [shape: f32[4,8], index: 5, kind: input, shape index: {}]   ;;  %s1927_s6 = inlined_call_operand.vmem [shape: f32[32,8], index: 6, kind: input, shape index: {}]   ;;  %s1928_s7 = inlined_call_operand.vmem [shape: f32[1,8], index: 7, kind: input, shape index: {}]   ;;  %s1929_s8 = inlined_call_operand.hbm [shape: f32[8,8], index: 8, kind: output, shape index: {}]  }
   0x1   :  { %14 = vsyncpa [#allocation6], 0 }
   0x2   :  { %15 = vsyncpa [#allocation9], 0 }
   0x3   :  { %16 = vsyncpa [#allocation4], 0  ;;  %s1572_s27 = smov [#allocation5]   ;;  %s1454_s9 = scalar_lea.hbm %s1923_s2, 2048 }
   0x4   :  { %s34_s28 = sshll.u32 %s1572_s27, 4  ;;  %p1455_p0 = scmp.ne.s32.totalorder %s1923_s2, %s1454_s9  ;;  %s35_s28 = int_to_ptr.vmem [resolvable:$true] %s34_s28 }
   0x5   :  { %p1458_p1 = scmp.lt.u32.totalorder %s1454_s9, %s1923_s2 }
   0x7   :  { %p1460_p2 = pnand %p1458_p1, %p1455_p0 }
   0x9   :  { %1463 = shalt.err (!%p1460_p2)
}
   0xa   :  { %s1464_s14 = scalar_lea.vmem %s35_s28, 2048  ;;  %p1469_p4 = scmp.lt.s32.totalorder %s35_s28, %s35_s28 }
   0xb   :  { %p1465_p3 = scmp.ne.s32.totalorder %s35_s28, %s1464_s14  ;;  %p1470_p5 = scmp.lt.s32.totalorder %s1464_s14, %s1464_s14 }
   0xd   :  { %p1471_p6 = por %p1470_p5, %p1469_p4 }
   0xf   :  { %p1472_p7 = pnand %p1471_p6, %p1465_p3 }
  0x11   :  { %1475 = shalt.err (!%p1472_p7)
}
  0x12   :  { %s1573_s15 = smov 128   ;;  %s1574_s16 = smov 8  }
  0x13   :  { %40 = dma.hbm_to_vmem [thread:$0]  %s1923_s2, 2048, %s35_s28, [#allocation6], %s1573_s15, %s1573_s15, %s1574_s16  }
  0x14   :  { %s1575_s19 = smov [#allocation2]   ;;  %s1576_s21 = smov [#allocation7]  }
  0x15   :  { %s23_s20 = sshll.u32 %s1575_s19, 4  ;;  %s46_s22 = sshll.u32 %s1576_s21, 4  ;;  %s24_s20 = int_to_ptr.vmem [resolvable:$true] %s23_s20  ;;  %s47_s22 = int_to_ptr.vmem [resolvable:$true] %s46_s22 }
  0x16   :  { %s1476_s25 = scalar_lea.hbm %s1921_s0, 128 }
  0x17   :  { %p1477_p8 = scmp.ne.s32.totalorder %s1921_s0, %s1476_s25  ;;  %p1480_p9 = scmp.lt.u32.totalorder %s1476_s25, %s1921_s0 }
  0x19   :  { %p1482_p10 = pnand %p1480_p9, %p1477_p8 }
  0x1b   :  { %1485 = shalt.err (!%p1482_p10)
}
  0x1c   :  { %s1486_s2 = scalar_lea.vmem %s24_s20, 128  ;;  %p1491_p12 = scmp.lt.s32.totalorder %s24_s20, %s24_s20 }
  0x1d   :  { %p1487_p11 = scmp.ne.s32.totalorder %s24_s20, %s1486_s2  ;;  %p1492_p13 = scmp.lt.s32.totalorder %s1486_s2, %s1486_s2 }
  0x1f   :  { %p1493_p0 = por %p1492_p13, %p1491_p12 }
  0x21   :  { %p1494_p1 = pnand %p1493_p0, %p1487_p11 }
  0x23   :  { %1497 = shalt.err (!%p1494_p1)
}
  0x24   :  { %26 = dma.hbm_to_vmem [thread:$0]  %s1921_s0, 128, %s24_s20, [#allocation3]  }
  0x25   :  { %s1498_s12 = scalar_lea.hbm %s1924_s3, 512 }
  0x26   :  { %p1499_p2 = scmp.ne.s32.totalorder %s1924_s3, %s1498_s12  ;;  %p1502_p3 = scmp.lt.u32.totalorder %s1498_s12, %s1924_s3 }
  0x28   :  { %p1504_p4 = pnand %p1502_p3, %p1499_p2 }
  0x2a   :  { %1507 = shalt.err (!%p1504_p4)
}
  0x2b   :  { %s1508_s19 = scalar_lea.vmem %s47_s22, 512  ;;  %p1513_p6 = scmp.lt.s32.totalorder %s47_s22, %s47_s22 }
  0x2c   :  { %p1509_p5 = scmp.ne.s32.totalorder %s47_s22, %s1508_s19  ;;  %p1514_p7 = scmp.lt.s32.totalorder %s1508_s19, %s1508_s19 }
  0x2e   :  { %p1515_p8 = por %p1514_p7, %p1513_p6 }
  0x30   :  { %p1516_p9 = pnand %p1515_p8, %p1509_p5 }
  0x32   :  { %1519 = shalt.err (!%p1516_p9)
}
  0x33   :  { %52 = dma.hbm_to_vmem [thread:$0]  %s1924_s3, 512, %s47_s22, [#allocation6], %s1573_s15, %s1573_s15, %s1574_s16  }
  0x34   :  { %s1577_s21 = smov [#allocation8]   ;;  %s1520_s26 = scalar_lea.hbm %s1926_s5, 64 }
  0x35   :  { %s61_s23 = sshll.u32 %s1577_s21, 4  ;;  %p1521_p10 = scmp.ne.s32.totalorder %s1926_s5, %s1520_s26  ;;  %s62_s23 = int_to_ptr.vmem [resolvable:$true] %s61_s23 }
  0x36   :  { %p1524_p11 = scmp.lt.u32.totalorder %s1520_s26, %s1926_s5 }
  0x38   :  { %p1526_p12 = pnand %p1524_p11, %p1521_p10 }
  0x3a   :  { %1529 = shalt.err (!%p1526_p12)
}
  0x3b   :  { %s1530_s28 = scalar_lea.vmem %s62_s23, 64  ;;  %p1535_p0 = scmp.lt.s32.totalorder %s62_s23, %s62_s23 }
  0x3c   :  { %p1531_p13 = scmp.ne.s32.totalorder %s62_s23, %s1530_s28  ;;  %p1536_p1 = scmp.lt.s32.totalorder %s1530_s28, %s1530_s28 }
  0x3e   :  { %p1537_p2 = por %p1536_p1, %p1535_p0 }
  0x40   :  { %p1538_p3 = pnand %p1537_p2, %p1531_p13 }
  0x42   :  { %1541 = shalt.err (!%p1538_p3)
}
  0x43   :  { %64 = dma.hbm_to_vmem [thread:$0]  %s1926_s5, 64, %s62_s23, [#allocation9]  }
  0x44   :  { %1564 = dma.done.wait [#allocation3], 128  }
  0x45   :  { %1565 = vsyncadd [#allocation3], 4294967168 }
  0x46   :  { %1566 = dma.done.wait [#allocation6], 2560  }
  0x47   :  { %1567 = vsyncadd [#allocation6], 4294964736 }
  0x48   :  { %1568 = dma.done.wait [#allocation9], 64  }
  0x49   :  { %1569 = vsyncadd [#allocation9], 4294967232  ;;  %vm85_vm0 = vcmask 130048   ;;  %v81_v0 = vld [vmem:[#allocation2] sm:$0xff]  ;;  %v108_v8 = vld [vmem:[%s1922_s1 + $0x8] sm:$0xff]  ;;  %v1578_v9 = vmov 0.0|0.0   ;;  %v109_v31 = vlaneseq }
  0x4a   :  { %v86_v1 = vsel %vm85_vm0, %v81_v0, 0.0  ;;  %v107_v7 = vld [vmem:[%s1922_s1] sm:$0xff]  ;;  %1372 = vmatprep.subr.bf16.mxu1 %v1578_v9  ;;  %vm1579_vm1 = vmmov 0   ;;  %v1580_v11 = vmov 0.0   ;;  %1378 = vmatprep.subr.bf16.mxu0 %v1578_v9  ;;  %v1231_v20 = vld [vmem:[%s1922_s1 + $0x10] sm:$0xff]  ;;  %v1232_v21 = vld [vmem:[%s1922_s1 + $0x18] sm:$0xff] }
  0x4b   :  { %87 = vadd.xlane.f32.xlu0 %v86_v1  ;;  %v1373_v10 = vpack.c.bf16 %v108_v8, %v107_v7  ;;  %1287 = vmatprep.mubr.msk.f32.mxu1 %vm1579_vm1, %v1580_v11  ;;  %v1376_v23 = vpack.c.bf16 %v1232_v21, %v1231_v20  ;;  %v264_v25 = vld [vmem:[#allocation5] sm:$0xff]  ;;  %v265_v26 = vld [vmem:[#allocation5 + $0x8] sm:$0xff]  ;;  %v266_v28 = vld [vmem:[#allocation5 + $0x10] sm:$0xff]  ;;  %v1717_v32 = vshrl.u32 %v109_v31, 7  ;;  %vm280_vm4 = vcmask 261120   ;;  %s1581_s27 = smov [#allocation10]  }
  0x4c   :  { %1305 = vmatprep.mubr.msk.f32.mxu0 %vm1579_vm1, %v1580_v11  ;;  %v1379_v27 = vpack.c.bf16 %v265_v26, %v264_v25  ;;  %v267_v29 = vld [vmem:[#allocation5 + $0x18] sm:$0xff]  ;;  %v1751_v62 = vld [vmem:[#allocation8] sm:$0xf]  ;;  %vm384_vm5 = vcmask 64512   ;;  %s1219_s29 = sshll.u32 %s1581_s27, 4  ;;  %s1220_s29 = int_to_ptr.vmem [resolvable:$true] %s1219_s29 }
  0x4d   :  { %1374 = vmatpush3.bf16.msra.mxu1 %v1373_v10  ;;  %v1382_v30 = vpack.c.bf16 %v267_v29, %v266_v28  ;;  %v1720_v33 = vsub.s32 0, %v1717_v32  ;;  %v1723_v34 = vsub.s32 1, %v1717_v32  ;;  %v1728_v35 = vld [vmem:[%s1925_s4] sm:$0xff]  ;;  %v1744_v45 = vsub.s32 2, %v1717_v32  ;;  %v1783_v26 = vld [vmem:[%s1925_s4 + $0x8] sm:$0x3f]  ;;  %p1547_p5 = scmp.lt.s32.totalorder %s1220_s29, %s1220_s29 }
  0x4e   :  { %1375 = vmatprep.subr.bf16.mxu1 %v1578_v9  ;;  %1380 = vmatpush3.bf16.msra.mxu0 %v1379_v27  ;;  %v484_v20 = vld [vmem:[#allocation5 + $0x58] sm:$0xff]  ;;  %s1542_s30 = scalar_lea.vmem %s1220_s29, 128 }
  0x4f   :  { %1381 = vmatprep.subr.bf16.mxu0 %v1578_v9  ;;  %v112_v37 = vrot.slane %v1728_v35, %v1720_v33  ;;  %v192_v39 = vrot.slane %v1728_v35, %v1723_v34  ;;  %v279_v46 = vrot.slane %v1728_v35, %v1744_v45  ;;  %v272_v63 = vrot.slane %v1751_v62, %v1720_v33  ;;  %p1543_p4 = scmp.ne.s32.totalorder %s1220_s29, %s1542_s30  ;;  %p1548_p6 = scmp.lt.s32.totalorder %s1542_s30, %s1542_s30 }
  0x50   :  { %v497_v28 = vrot.slane %v1783_v26, %v1720_v33 }
  0x51   :  { %p1549_p7 = por %p1548_p6, %p1547_p5 }
  0x52   :  { %1383 = vmatpush3.bf16.msra.mxu0 %v1382_v30 }
  0x53   :  { %1324 = vmatprep.subr.mxu0 %v1580_v11  ;;  %p1550_p8 = pnand %p1549_p7, %p1543_p4 }
  0xd8   :  { %v88_v2 = vpop.xlane.xlu0 %87 }
  0xd9   :  { %v1682_v3 = vmul.f32 0.0625, %v88_v2 }
  0xdb   :  { %v91_v4 = vsub.f32 %v81_v0, %v1682_v3 }
  0xdd   :  { %v92_v5 = vmul.f32 %v91_v4, %v91_v4 }
  0xdf   :  { %v93_v6 = vsel %vm85_vm0, %v92_v5, 0.0  ;;  %v381_v5 = vsub.s32 4, %v1717_v32 }
  0xe0   :  { %94 = vadd.xlane.f32.xlu0 %v93_v6 }
  0xe1   :  { %v1766_v10 = vrot.slane %v1728_v35, %v381_v5 }
  0xf6   :  { %274 = vbcast.lane.b32.xlu0 %v272_v63, 256 }
 0x16d   :  { %v95_v12 = vpop.xlane.xlu0 %94 }
 0x16e   :  { %v96_v13 = vmul.f32 0.0625, %v95_v12  ;;  %v481_v12 = vld [vmem:[#allocation5 + $0x40] sm:$0xff] }
 0x170   :  { %v97_v14 = vadd.f32 1e-05, %v96_v13  ;;  %v482_v13 = vld [vmem:[#allocation5 + $0x48] sm:$0xff] }
 0x172   :  { %1418 = vrsqrt.f32 %v97_v14  ;;  %vm100_vm2 = vcmp.eq.f32.partialorder %v97_v14, inf  ;;  %v103_v17 = vand.u32 2147483648, %v97_v14  ;;  %vm102_vm3 = vcmp.eq.f32.partialorder %v97_v14, 0.0 }
 0x17c   :  { %v1419_v15 = vpop.eup %1418 }
 0x17d   :  { %v99_v16 = vmul.f32 %v1419_v15, %v97_v14 }
 0x17f   :  { %v101_v18 = vsel %vm100_vm2, %v97_v14, %v99_v16  ;;  %v268_v16 = vld [vmem:[#allocation7] sm:$0xff] }
 0x180   :  { %v1699_v19 = vsel %vm102_vm3, %v103_v17, %v101_v18  ;;  %v1385_v17 = vpack.c.bf16 %v482_v13, %v481_v12  ;;  %v483_v18 = vld [vmem:[#allocation5 + $0x50] sm:$0xff]  ;;  %v1797_v12 = vrot.slane %v1783_v26, %v1723_v34 }
 0x181   :  { %1420 = vrcp.f32 %v1699_v19  ;;  %v1388_v21 = vpack.c.bf16 %v484_v20, %v483_v18 }
 0x18b   :  { %v1421_v22 = vpop.eup %1420 }
 0x18c   :  { %v106_v24 = vmul.f32 %v1421_v22, %v91_v4  ;;  %v1756_v4 = vsub.s32 3, %v1717_v32  ;;  %v275_v22 = vpop.permute.xlu0 %274 }
 0x18e   :  { %1288 = vmatmul.mubr.msk.f32.vlgmr.msra.gmra.mrb[0].mxu1 %vm85_vm0, %v106_v24  ;;  %v1761_v6 = vrot.slane %v1728_v35, %v1756_v4 }
 0x18f   :  { %1377 = vmatpush3.bf16.msra.mxu1 %v1376_v23  ;;  %1294 = vmatprep.mubr.msk.f32.mxu1 %vm1579_vm1, %v1580_v11 }
 0x190   :  { %1308 = vmatprep.subr.mxu1 %v1580_v11 }
 0x192   :  { %1295 = vmatmul.mubr.msk.f32.vlgmr.msra.gmra.mrb[2].mxu1 %vm85_vm0, %v106_v24 }
 0x193   :  { %1310 = vmatprep.mubr.msk.f32.mxu1 %vm1579_vm1, %v1580_v11 }
 0x261   :  { %v182_v36 = vpop.f32.mrb[0].mxu1 }
 0x262   :  { %v1289_v38 = vpop.f32.mrb[1].mxu1  ;;  %v183_v41 = vadd.f32 %v182_v36, %v112_v37 }
 0x265   :  { %v259_v40 = vpop.f32.mrb[2].mxu1 }
 0x266   :  { %v1734_v42 = vadd.f32 %v259_v40, %v192_v39  ;;  %v1296_v43 = vpop.f32.mrb[3].mxu1 }
 0x268   :  { %v1737_v44 = vsub.f32 %v183_v41, %v1734_v42 }
 0x26a   :  { %1306 = vmatmul.mubr.msk.f32.vlgmr.msra.gmra.mrb[0].mxu0 %vm280_vm4, %v1737_v44 }
 0x26b   :  { %1326 = vmatprep.mubr.msk.f32.mxu0 %vm1579_vm1, %v1580_v11 }
 0x33d   :  { %v350_v47 = vpop.f32.mrb[0].mxu0 }
 0x33e   :  { %v351_v48 = vadd.f32 %v350_v47, %v279_v46  ;;  %v1307_v49 = vpop.f32.mrb[1].mxu0 }
 0x340   :  { %v355_v50 = vmul.f32 0.70710677, %v351_v48  ;;  %v354_v52 = vmul.f32 0.5, %v351_v48 }
 0x342   :  { %1422 = verf.f32 %v355_v50 }
 0x34c   :  { %v1423_v51 = vpop.eup %1422 }
 0x34d   :  { %v357_v53 = vadd.f32 1.0, %v1423_v51 }
 0x34f   :  { %v358_v54 = vmul.f32 %v357_v53, %v354_v52 }
 0x351   :  { %v359_v55 = vadd.f32 %v358_v54, %v1737_v44 }
 0x353   :  { %v360_v56 = vsel %vm280_vm4, %v359_v55, 0.0 }
 0x354   :  { %361 = vadd.xlane.f32.xlu1 %v360_v56 }
 0x3e1   :  { %v362_v57 = vpop.xlane.xlu1 %361 }
 0x3e2   :  { %v364_v58 = vmul.f32 0.03125, %v362_v57 }
 0x3e4   :  { %v365_v59 = vsub.f32 %v359_v55, %v364_v58 }
 0x3e6   :  { %v366_v60 = vmul.f32 %v365_v59, %v365_v59 }
 0x3e8   :  { %v367_v61 = vsel %vm280_vm4, %v366_v60, 0.0 }
 0x3e9   :  { %368 = vadd.xlane.f32.xlu1 %v367_v61 }
 0x476   :  { %v369_v0 = vpop.xlane.xlu1 %368 }
 0x477   :  { %v370_v1 = vmul.f32 0.03125, %v369_v0 }
 0x479   :  { %v371_v2 = vadd.f32 1e-05, %v370_v1 }
 0x47b   :  { %1424 = vrsqrt.f32 %v371_v2 }
 0x485   :  { %v1425_v7 = vpop.eup %1424 }
 0x486   :  { %v373_v8 = vmul.f32 %v1425_v7, %v365_v59 }
 0x488   :  { %v378_v14 = vmul.f32 %v1761_v6, %v373_v8 }
 0x48a   :  { %v383_v15 = vadd.f32 %v1766_v10, %v378_v14 }
 0x48c   :  { %1309 = vmatpush3.msra.mxu1 %v383_v15 }
 0x48d   :  { %1311 = vmatmul.mubr.msk.f32.vlgmr.msra.gmra.mrb[4].mxu1 %vm384_vm5, %v268_v16  ;;  %1384 = vmatprep.subr.bf16.mxu1 %v1578_v9  ;;  %v696_v16 = vld [vmem:[#allocation5 + $0x20] sm:$0xff] }
 0x48e   :  { %1386 = vmatpush3.bf16.msra.mxu1 %v1385_v17  ;;  %1321 = vmatprep.mubr.msk.f32.mxu1 %vm1579_vm1, %v1580_v11  ;;  %v697_v17 = vld [vmem:[#allocation5 + $0x28] sm:$0xff] }
 0x48f   :  { %1387 = vmatprep.subr.bf16.mxu1 %v1578_v9 }
 0x492   :  { %1389 = vmatpush3.bf16.msra.mxu1 %v1388_v21 }
 0x493   :  { %1340 = vmatprep.subr.mxu1 %v1580_v11 }
 0x495   :  { %1322 = vmatmul.mubr.msk.f32.vlgmr.msra.gmra.mrb[6].mxu1 %vm280_vm4, %v1734_v42 }
 0x496   :  { %1342 = vmatprep.mubr.msk.f32.mxu1 %vm1579_vm1, %v1580_v11 }
 0x560   :  { %v454_v23 = vpop.f32.mrb[4].mxu1 }
 0x561   :  { %v455_v24 = vadd.f32 %v454_v23, %v275_v22  ;;  %v1312_v25 = vpop.f32.mrb[5].mxu1  ;;  %v486_v22 = vld [vmem:[#allocation7 + $0x10] sm:$0xff]  ;;  %v1391_v23 = vpack.c.bf16 %v697_v17, %v696_v16 }
 0x562   :  { %v698_v25 = vld [vmem:[#allocation5 + $0x30] sm:$0xff] }
 0x563   :  { %v459_v27 = vmul.f32 0.70710677, %v455_v24  ;;  %v458_v39 = vmul.f32 0.5, %v455_v24 }
 0x565   :  { %1426 = verf.f32 %v459_v27  ;;  %v699_v27 = vld [vmem:[#allocation5 + $0x38] sm:$0xff] }
 0x568   :  { %v567_v29 = vpop.f32.mrb[6].mxu1 }
 0x569   :  { %v568_v30 = vadd.f32 %v567_v29, %v497_v28  ;;  %v1323_v31 = vpop.f32.mrb[7].mxu1 }
 0x56b   :  { %v572_v36 = vmul.f32 0.70710677, %v568_v30  ;;  %v571_v43 = vmul.f32 0.5, %v568_v30 }
 0x56d   :  { %1428 = verf.f32 %v572_v36 }
 0x56f   :  { %v1427_v37 = vpop.eup %1426 }
 0x570   :  { %v461_v38 = vadd.f32 1.0, %v1427_v37 }
 0x572   :  { %v462_v40 = vmul.f32 %v461_v38, %v458_v39  ;;  %v711_v38 = vsub.s32 5, %v1717_v32 }
 0x574   :  { %v463_v48 = vmul.f32 %v462_v40, %v383_v15  ;;  %v1801_v15 = vrot.slane %v1783_v26, %v1744_v45 }
 0x576   :  { %v464_v33 = vadd.f32 %v463_v48, %v1737_v44  ;;  %v490_v44 = vrot.slane %v1751_v62, %v1744_v45  ;;  %v1394_v45 = vpack.c.bf16 %v699_v27, %v698_v25  ;;  %v911_v25 = vld [vmem:[#allocation5 + $0x60] sm:$0xff]  ;;  %v912_v27 = vld [vmem:[#allocation5 + $0x68] sm:$0xff] }
 0x577   :  { %v1429_v41 = vpop.eup %1428 }
 0x578   :  { %v574_v46 = vadd.f32 1.0, %v1429_v41  ;;  %v465_v51 = vsel %vm280_vm4, %v464_v33, 0.0 }
 0x57a   :  { %v575_v47 = vmul.f32 %v574_v46, %v571_v43 }
 0x57c   :  { %v576_v49 = vadd.f32 %v575_v47, %v1734_v42 }
 0x57e   :  { %v577_v50 = vsel %vm280_vm4, %v576_v49, 0.0 }
 0x57f   :  { %578 = vadd.xlane.f32.xlu1 %v577_v50 }
 0x583   :  { %466 = vadd.xlane.f32.xlu1 %v465_v51 }
 0x60c   :  { %v579_v52 = vpop.xlane.xlu1 %578 }
 0x60d   :  { %v580_v53 = vmul.f32 0.03125, %v579_v52 }
 0x60f   :  { %v581_v54 = vsub.f32 %v576_v49, %v580_v53 }
 0x610   :  { %v467_v55 = vpop.xlane.xlu1 %466 }
 0x611   :  { %v468_v56 = vmul.f32 0.03125, %v467_v55  ;;  %v582_v57 = vmul.f32 %v581_v54, %v581_v54 }
 0x613   :  { %v469_v58 = vsub.f32 %v464_v33, %v468_v56  ;;  %v583_v59 = vsel %vm280_vm4, %v582_v57, 0.0 }
 0x614   :  { %584 = vadd.xlane.f32.xlu1 %v583_v59 }
 0x615   :  { %v470_v60 = vmul.f32 %v469_v58, %v469_v58 }
 0x617   :  { %v471_v61 = vsel %vm280_vm4, %v470_v60, 0.0 }
 0x618   :  { %472 = vadd.xlane.f32.xlu1 %v471_v61 }
 0x629   :  { %492 = vbcast.lane.b32.xlu1 %v490_v44, 256 }
 0x6a1   :  { %v585_v63 = vpop.xlane.xlu1 %584 }
 0x6a2   :  { %v586_v0 = vmul.f32 0.03125, %v585_v63 }
 0x6a4   :  { %v587_v1 = vadd.f32 1e-05, %v586_v0 }
 0x6a5   :  { %v473_v2 = vpop.xlane.xlu1 %472 }
 0x6a6   :  { %1430 = vrsqrt.f32 %v587_v1  ;;  %v474_v7 = vmul.f32 0.03125, %v473_v2 }
 0x6a8   :  { %v475_v8 = vadd.f32 1e-05, %v474_v7 }
 0x6a9   :  { %v493_v30 = vpop.permute.xlu1 %492 }
 0x6aa   :  { %1432 = vrsqrt.f32 %v475_v8 }
 0x6b0   :  { %v1431_v13 = vpop.eup %1430 }
 0x6b1   :  { %v589_v14 = vmul.f32 %v1431_v13, %v581_v54 }
 0x6b3   :  { %v594_v18 = vmul.f32 %v1797_v12, %v589_v14 }
 0x6b4   :  { %v1433_v20 = vpop.eup %1432 }
 0x6b5   :  { %v599_v21 = vadd.f32 %v1801_v15, %v594_v18  ;;  %v477_v24 = vmul.f32 %v1433_v20, %v469_v58  ;;  %v807_v18 = vsub.s32 6, %v1717_v32  ;;  %v812_v20 = vsub.s32 7, %v1717_v32 }
 0x6b7   :  { %1325 = vmatpush3.msra.mxu0 %v599_v21  ;;  %v478_v28 = vmul.f32 %v477_v24, %v1761_v6  ;;  %v712_v6 = vrot.slane %v1728_v35, %v711_v38  ;;  %v1835_v24 = vrot.slane %v1728_v35, %v812_v20 }
 0x6b8   :  { %1327 = vmatmul.mubr.msk.f32.vlgmr.msra.gmra.mrb[2].mxu0 %vm384_vm5, %v486_v22  ;;  %1390 = vmatprep.subr.bf16.mxu0 %v1578_v9 }
 0x6b9   :  { %1392 = vmatpush3.bf16.msra.mxu0 %v1391_v23  ;;  %1337 = vmatprep.mubr.msk.f32.mxu0 %vm1579_vm1, %v1580_v11  ;;  %v1812_v29 = vadd.f32 %v478_v28, %v1766_v10 }
 0x6ba   :  { %1393 = vmatprep.subr.bf16.mxu0 %v1578_v9 }
 0x6bd   :  { %1395 = vmatpush3.bf16.msra.mxu0 %v1394_v45 }
 0x6be   :  { %1356 = vmatprep.subr.mxu0 %v1580_v11 }
 0x6c0   :  { %1338 = vmatmul.mubr.msk.f32.vlgmr.msra.gmra.mrb[4].mxu0 %vm280_vm4, %v1812_v29 }
 0x6c1   :  { %1358 = vmatprep.mubr.msk.f32.mxu0 %vm1579_vm1, %v1580_v11 }
 0x78b   :  { %v669_v31 = vpop.f32.mrb[2].mxu0 }
 0x78c   :  { %v670_v36 = vadd.f32 %v669_v31, %v493_v30  ;;  %v1328_v37 = vpop.f32.mrb[3].mxu0  ;;  %v701_v31 = vld [vmem:[#allocation7 + $0x8] sm:$0xff] }
 0x78e   :  { %v674_v39 = vmul.f32 0.70710677, %v670_v36  ;;  %v673_v47 = vmul.f32 0.5, %v670_v36  ;;  %v1397_v36 = vpack.c.bf16 %v912_v27, %v911_v25 }
 0x790   :  { %1434 = verf.f32 %v674_v39  ;;  %v913_v39 = vld [vmem:[#allocation5 + $0x70] sm:$0xff] }
 0x793   :  { %v782_v10 = vpop.f32.mrb[4].mxu0 }
 0x794   :  { %v783_v40 = vadd.f32 %v782_v10, %v712_v6  ;;  %v1339_v41 = vpop.f32.mrb[5].mxu0  ;;  %v914_v6 = vld [vmem:[#allocation5 + $0x78] sm:$0xff] }
 0x796   :  { %v787_v43 = vmul.f32 0.70710677, %v783_v40  ;;  %v786_v52 = vmul.f32 0.5, %v783_v40 }
 0x798   :  { %1436 = verf.f32 %v787_v43 }
 0x79a   :  { %v1435_v46 = vpop.eup %1434 }
 0x79b   :  { %v676_v48 = vadd.f32 1.0, %v1435_v46  ;;  %v927_v46 = vrot.slane %v1783_v26, %v1756_v4 }
 0x79d   :  { %v677_v49 = vmul.f32 %v676_v48, %v673_v47 }
 0x79f   :  { %v678_v50 = vmul.f32 %v677_v49, %v599_v21  ;;  %v1832_v21 = vrot.slane %v1728_v35, %v807_v18  ;;  %v1400_v35 = vpack.c.bf16 %v914_v6, %v913_v39 }
 0x7a1   :  { %v679_v33 = vadd.f32 %v678_v50, %v1734_v42 }
 0x7a2   :  { %v1437_v51 = vpop.eup %1436 }
 0x7a3   :  { %v789_v53 = vadd.f32 1.0, %v1437_v51  ;;  %v680_v54 = vsel %vm280_vm4, %v679_v33, 0.0 }
 0x7a4   :  { %681 = vadd.xlane.f32.xlu1 %v680_v54  ;;  %v920_v54 = vrot.slane %v1751_v62, %v1756_v4  ;;  %v1865_v4 = vrot.slane %v1783_v26, %v381_v5 }
 0x7a5   :  { %v790_v55 = vmul.f32 %v789_v53, %v786_v52 }
 0x7a7   :  { %v791_v56 = vadd.f32 %v790_v55, %v1812_v29 }
 0x7a9   :  { %v792_v57 = vsel %vm280_vm4, %v791_v56, 0.0 }
 0x7aa   :  { %793 = vadd.xlane.f32.xlu0 %v792_v57 }
 0x7b5   :  { %922 = vbcast.lane.b32.xlu1 %v920_v54, 256 }
 0x831   :  { %v682_v58 = vpop.xlane.xlu1 %681 }
 0x832   :  { %v683_v59 = vmul.f32 0.03125, %v682_v58 }
 0x834   :  { %v684_v44 = vsub.f32 %v679_v33, %v683_v59 }
 0x836   :  { %v685_v1 = vmul.f32 %v684_v44, %v684_v44 }
 0x837   :  { %v794_v60 = vpop.xlane.xlu0 %793 }
 0x838   :  { %v795_v61 = vmul.f32 0.03125, %v794_v60  ;;  %v686_v2 = vsel %vm280_vm4, %v685_v1, 0.0  ;;  %v705_v60 = vrot.slane %v1751_v62, %v1723_v34 }
 0x83a   :  { %v796_v63 = vsub.f32 %v791_v56, %v795_v61 }
 0x83c   :  { %v797_v0 = vmul.f32 %v796_v63, %v796_v63 }
 0x83e   :  { %v798_v42 = vsel %vm280_vm4, %v797_v0, 0.0 }
 0x83f   :  { %799 = vadd.xlane.f32.xlu0 %v798_v42 }
 0x843   :  { %687 = vadd.xlane.f32.xlu0 %v686_v2 }
 0x8cc   :  { %v800_v7 = vpop.xlane.xlu0 %799 }
 0x8cd   :  { %v801_v8 = vmul.f32 0.03125, %v800_v7  ;;  %v1870_v7 = vrot.slane %v1783_v26, %v711_v38  ;;  %v923_v38 = vpop.permute.xlu1 %922 }
 0x8cf   :  { %v802_v13 = vadd.f32 1e-05, %v801_v8 }
 0x8d0   :  { %v688_v14 = vpop.xlane.xlu0 %687 }
 0x8d1   :  { %1438 = vrsqrt.f32 %v802_v13  ;;  %v689_v16 = vmul.f32 0.03125, %v688_v14 }
 0x8d3   :  { %v690_v17 = vadd.f32 1e-05, %v689_v16 }
 0x8d5   :  { %1440 = vrsqrt.f32 %v690_v17  ;;  %v916_v17 = vld [vmem:[#allocation7 + $0x18] sm:$0xff] }
 0x8db   :  { %v1439_v22 = vpop.eup %1438 }
 0x8dc   :  { %v804_v23 = vmul.f32 %v1439_v22, %v796_v63 }
 0x8de   :  { %v809_v45 = vmul.f32 %v1832_v21, %v804_v23 }
 0x8df   :  { %v1441_v28 = vpop.eup %1440 }
 0x8e0   :  { %v1839_v30 = vadd.f32 %v1835_v24, %v809_v45  ;;  %v692_v37 = vmul.f32 %v1441_v28, %v684_v44 }
 0x8e2   :  { %1341 = vmatpush3.msra.mxu1 %v1839_v30  ;;  %v693_v10 = vmul.f32 %v692_v37, %v1797_v12 }
 0x8e3   :  { %1343 = vmatmul.mubr.msk.f32.vlgmr.msra.gmra.mrb[8].mxu1 %vm384_vm5, %v701_v31  ;;  %1396 = vmatprep.subr.bf16.mxu1 %v1578_v9 }
 0x8e4   :  { %1398 = vmatpush3.bf16.msra.mxu1 %v1397_v36  ;;  %1353 = vmatprep.mubr.msk.f32.mxu1 %vm1579_vm1, %v1580_v11  ;;  %v1849_v40 = vadd.f32 %v693_v10, %v1801_v15 }
 0x8e5   :  { %1399 = vmatprep.subr.bf16.mxu1 %v1578_v9 }
 0x8e8   :  { %1401 = vmatpush3.bf16.msra.mxu1 %v1400_v35 }
 0x8eb   :  { %1354 = vmatmul.mubr.msk.f32.vlgmr.msra.gmra.mrb[10].mxu1 %vm280_vm4, %v1849_v40 }
 0x9b6   :  { %v884_v41 = vpop.f32.mrb[8].mxu1 }
 0x9b7   :  { %v1344_v43 = vpop.f32.mrb[9].mxu1 }
 0x9be   :  { %v997_v47 = vpop.f32.mrb[10].mxu1 }
 0x9bf   :  { %v998_v48 = vadd.f32 %v997_v47, %v927_v46  ;;  %v1355_v49 = vpop.f32.mrb[11].mxu1 }
 0x9c1   :  { %v1002_v50 = vmul.f32 0.70710677, %v998_v48  ;;  %v1001_v51 = vmul.f32 0.5, %v998_v48  ;;  %v1126_v48 = vld [vmem:[%s1927_s6] sm:$0xff] }
 0x9c3   :  { %1442 = verf.f32 %v1002_v50  ;;  %v1128_v50 = vld [vmem:[%s1927_s6 + $0x10] sm:$0xff] }
 0x9cd   :  { %v1443_v33 = vpop.eup %1442 }
 0x9ce   :  { %v1004_v12 = vadd.f32 1.0, %v1443_v33  ;;  %v1129_v33 = vld [vmem:[%s1927_s6 + $0x18] sm:$0xff] }
 0x9d0   :  { %v1005_v52 = vmul.f32 %v1004_v12, %v1001_v51  ;;  %v1406_v51 = vpack.c.bf16 %v1129_v33, %v1128_v50 }
 0x9d2   :  { %v1006_v15 = vadd.f32 %v1005_v52, %v1849_v40 }
 0x9d4   :  { %v1007_v53 = vsel %vm280_vm4, %v1006_v15, 0.0 }
 0x9d5   :  { %1008 = vadd.xlane.f32.xlu0 %v1007_v53 }
 0xa62   :  { %v1009_v55 = vpop.xlane.xlu0 %1008 }
 0xa63   :  { %v1010_v56 = vmul.f32 0.03125, %v1009_v55 }
 0xa65   :  { %v1011_v57 = vsub.f32 %v1006_v15, %v1010_v56 }
 0xa67   :  { %v1012_v58 = vmul.f32 %v1011_v57, %v1011_v57 }
 0xa69   :  { %v1013_v59 = vsel %vm280_vm4, %v1012_v58, 0.0 }
 0xa6a   :  { %1014 = vadd.xlane.f32.xlu0 %v1013_v59 }
 0xa80   :  { %707 = vbcast.lane.b32.xlu0 %v705_v60, 256 }
 0xaf7   :  { %v1015_v61 = vpop.xlane.xlu0 %1014 }
 0xaf8   :  { %v1016_v44 = vmul.f32 0.03125, %v1015_v61 }
 0xafa   :  { %v1017_v63 = vadd.f32 1e-05, %v1016_v44 }
 0xafb   :  { %v708_v0 = vpop.permute.xlu0 %707 }
 0xafc   :  { %1444 = vrsqrt.f32 %v1017_v63  ;;  %v885_v42 = vadd.f32 %v884_v41, %v708_v0  ;;  %v1242_v0 = vld [vmem:[%s1928_s7] ss:$0 sm:$0xff] }
 0xafe   :  { %v889_v1 = vmul.f32 0.70710677, %v885_v42  ;;  %v888_v13 = vmul.f32 0.5, %v885_v42 }
 0xb00   :  { %1446 = verf.f32 %v889_v1 }
 0xb06   :  { %v1445_v2 = vpop.eup %1444 }
 0xb07   :  { %v1019_v34 = vmul.f32 %v1445_v2, %v1011_v57 }
 0xb09   :  { %v1024_v62 = vmul.f32 %v1865_v4, %v1019_v34 }
 0xb0a   :  { %v1447_v8 = vpop.eup %1446 }
 0xb0b   :  { %v891_v14 = vadd.f32 1.0, %v1447_v8  ;;  %v1029_v16 = vadd.f32 %v1870_v7, %v1024_v62 }
 0xb0d   :  { %v892_v18 = vmul.f32 %v891_v14, %v888_v13  ;;  %1357 = vmatpush3.msra.mxu0 %v1029_v16 }
 0xb0e   :  { %1359 = vmatmul.mubr.msk.f32.vlgmr.msra.gmra.mrb[6].mxu0 %vm384_vm5, %v916_v17  ;;  %1402 = vmatprep.subr.bf16.mxu0 %v1578_v9 }
 0xb0f   :  { %v893_v32 = vmul.f32 %v892_v18, %v1839_v30  ;;  %1369 = vmatprep.mubr.msk.f32.mxu0 %vm1579_vm1, %v1580_v11 }
 0xb11   :  { %v894_v5 = vadd.f32 %v893_v32, %v1812_v29 }
 0xb13   :  { %v895_v26 = vsel %vm280_vm4, %v894_v5, 0.0 }
 0xb14   :  { %896 = vadd.xlane.f32.xlu1 %v895_v26 }
 0xba1   :  { %v897_v27 = vpop.xlane.xlu1 %896 }
 0xba2   :  { %v898_v28 = vmul.f32 0.03125, %v897_v27 }
 0xba4   :  { %v899_v37 = vsub.f32 %v894_v5, %v898_v28 }
 0xba6   :  { %v900_v6 = vmul.f32 %v899_v37, %v899_v37 }
 0xba8   :  { %v901_v35 = vsel %vm280_vm4, %v900_v6, 0.0 }
 0xbe1   :  { %v1099_v20 = vpop.f32.mrb[6].mxu0 }
 0xbe2   :  { %v1100_v22 = vadd.f32 %v1099_v20, %v923_v38  ;;  %v1360_v23 = vpop.f32.mrb[7].mxu0 }
 0xbe4   :  { %v1104_v25 = vmul.f32 0.70710677, %v1100_v22  ;;  %v1103_v31 = vmul.f32 0.5, %v1100_v22 }
 0xbe6   :  { %1448 = verf.f32 %v1104_v25 }
 0xbf0   :  { %v1449_v45 = vpop.eup %1448 }
 0xbf1   :  { %v1106_v36 = vadd.f32 1.0, %v1449_v45 }
 0xbf3   :  { %v1107_v30 = vmul.f32 %v1106_v36, %v1103_v31 }
 0xbf5   :  { %v1108_v39 = vmul.f32 %v1107_v30, %v1029_v16 }
 0xbf7   :  { %v1109_v11 = vadd.f32 %v1108_v39, %v1849_v40  ;;  %v1127_v40 = vld [vmem:[%s1927_s6 + $0x8] sm:$0xff] }
 0xbf8   :  { %v1403_v49 = vpack.c.bf16 %v1127_v40, %v1126_v48 }
 0xbf9   :  { %v1110_v29 = vsel %vm280_vm4, %v1109_v11, 0.0 }
 0xbfa   :  { %1111 = vadd.xlane.f32.xlu0 %v1110_v29  ;;  %1404 = vmatpush3.bf16.msra.mxu0 %v1403_v49 }
 0xbfb   :  { %1405 = vmatprep.subr.bf16.mxu0 %v1578_v9 }
 0xbfe   :  { %902 = vadd.xlane.f32.xlu0 %v901_v35  ;;  %1407 = vmatpush3.bf16.msra.mxu0 %v1406_v51 }
 0xc87   :  { %v1112_v10 = vpop.xlane.xlu0 %1111 }
 0xc88   :  { %v1113_v41 = vmul.f32 0.03125, %v1112_v10 }
 0xc8a   :  { %v1114_v43 = vsub.f32 %v1109_v11, %v1113_v41 }
 0xc8b   :  { %v903_v12 = vpop.xlane.xlu0 %902 }
 0xc8c   :  { %v1115_v46 = vmul.f32 %v1114_v43, %v1114_v43  ;;  %v904_v52 = vmul.f32 0.03125, %v903_v12 }
 0xc8e   :  { %v1116_v47 = vsel %vm280_vm4, %v1115_v46, 0.0  ;;  %v905_v15 = vadd.f32 1e-05, %v904_v52 }
 0xc8f   :  { %1117 = vadd.xlane.f32.xlu1 %v1116_v47 }
 0xc90   :  { %1450 = vrsqrt.f32 %v905_v15 }
 0xc9a   :  { %v1451_v56 = vpop.eup %1450 }
 0xc9b   :  { %v907_v9 = vmul.f32 %v1451_v56, %v899_v37 }
 0xc9d   :  { %v908_v58 = vmul.f32 %v907_v9, %v1832_v21 }
 0xc9f   :  { %v909_v61 = vadd.f32 %v908_v58, %v1835_v24 }
 0xd1c   :  { %v1118_v53 = vpop.xlane.xlu1 %1117 }
 0xd1d   :  { %v1119_v54 = vmul.f32 0.03125, %v1118_v53 }
 0xd1f   :  { %v1120_v55 = vadd.f32 1e-05, %v1119_v54 }
 0xd21   :  { %1452 = vrsqrt.f32 %v1120_v55 }
 0xd2b   :  { %v1453_v57 = vpop.eup %1452 }
 0xd2c   :  { %v1122_v59 = vmul.f32 %v1453_v57, %v1114_v43 }
 0xd2e   :  { %v1123_v60 = vmul.f32 %v1122_v59, %v1865_v4 }
 0xd30   :  { %v1124_v44 = vadd.f32 %v1123_v60, %v1870_v7 }
 0xd32   :  { %v1125_v63 = vadd.f32 %v1124_v44, %v909_v61 }
 0xd34   :  { %1370 = vmatmul.mubr.msk.f32.vlgmr.msra.gmra.mrb[8].mxu0 %vm280_vm4, %v1125_v63 }
 0xe07   :  { %v1206_v42 = vpop.f32.mrb[8].mxu0 }
 0xe08   :  { %v1207_v1 = vadd.f32 %v1242_v0, %v1206_v42  ;;  %v1371_v2 = vpop.f32.mrb[9].mxu0 }
 0xe0a   :  { %v1210_v21 = vmul.f32 %v1207_v1, %v1699_v19 }
 0xe0c   :  { %v1211_v4 = vadd.f32 %v1210_v21, %v1682_v3 }
 0xe0e   :  { %1212 = vst.msk [vmem:[#allocation10] sm:$0xff] %vm384_vm5, %v1211_v4 }
 0xe0f   :  { %1553 = shalt.err (!%p1550_p8)
}
 0xe10   :  { %s1554_s28 = scalar_lea.hbm %s1929_s8, 128 }
 0xe11   :  { %p1555_p9 = scmp.ne.s32.totalorder %s1929_s8, %s1554_s28  ;;  %p1558_p10 = scmp.lt.u32.totalorder %s1554_s28, %s1929_s8 }
 0xe13   :  { %p1560_p11 = pnand %p1558_p10, %p1555_p9 }
 0xe15   :  { %1563 = shalt.err (!%p1560_p11)
}
 0xe16   :  { %1222 = dma.vmem_to_hbm [thread:$0]  %s1220_s29, 128, %s1929_s8, [#allocation4]  }
 0xe17   :  { %1570 = dma.done.wait [#allocation4], 128  }
 0xe18   :  { %1571 = vsyncadd [#allocation4], 4294967168 }
 0xe19   :  { %1226 = vsyncpa [#allocation3], 1 }
 0xe1a   :  { %1227 = vsyncpa [#allocation6], 1 }
 0xe1b   :  { %1228 = vsyncpa [#allocation9], 1 }
 0xe1c   :  { %1229 = vsyncpa [#allocation4], 1 }

</bundles_post_ra>
